<compile_context>
chip_gen: v7x
topology: tpu7x:2x2x1
jax: 0.10.0
libtpu: 0.0.40
codegen_flags: <defaults>
</compile_context>

<pallas_src>
import math

import jax
import jax.numpy as jnp
from jax import lax
from jax.experimental import pallas as pl
from jax.experimental.pallas import tpu as pltpu

# ----------------------------- hyper-parameters ------------------------------
B = 2            # batch
L = 8            # sequence length
D = 32           # hidden_size
H = 4            # num_attention_heads
HD = D // H      # attention_head_size
CYCLE_NUM = 2
V_SIZE = 50      # vocabulary size
LABEL_NUM = 2
EPS = 1e-12      # LayerNorm variance epsilon (TF style)
SCALE = 1.0 / math.sqrt(HD)

BL = B * L
D3 = 3 * D
LANES = 128      # slab lane width (= 4 * D)

# ------------------------- packed parameter slab layout -----------------------
# One lane-dense f32 (SLAB_ROWS, 128) slab; every block starts on an 8-row
# (sublane-tile) boundary so all in-kernel unpacking slices are aligned.
R_WSAT = 0                      # (D, 4D)   fused satellite Q|K|V|O weight
R_WREL = R_WSAT + D             # (D, 4D)   fused relay     Q|K|V|O weight
R_FCW = R_WREL + D              # (D, 128)  classifier weight, lane-padded
R_MASK = R_FCW + D              # (D, 128)  block-diag head mask in lanes 0:D
R_PLAST = R_MASK + D            # (BL,128)  cycle-shift permutation in lanes 0:BL
R_BSAT = R_PLAST + BL           # row: fused satellite biases  (4D lanes)
R_BREL = R_BSAT + 8             # row: fused relay biases
R_LN = R_BREL + 8               # row: lnsw|lnsb|lnrw|lnrb
R_FCB = R_LN + 8                # row: classifier bias (lane-padded)
SLAB_ROWS = R_FCB + 8           # 176 rows  (~88 KiB)


def _build_param_slab(p):
    """Pack all weights + constant masks into one lane-dense f32 slab (host side)."""
    f32 = jnp.float32
    w_sat = jnp.concatenate([p['swq'], p['swk'], p['swv'], p['swo']], axis=1)   # (D, 4D)
    w_rel = jnp.concatenate([p['rwq'], p['rwk'], p['rwv'], p['rwo']], axis=1)   # (D, 4D)
    b_sat = jnp.concatenate([p['sbq'], p['sbk'], p['sbv'], p['sbo']])           # (4D,)
    b_rel = jnp.concatenate([p['rbq'], p['rbk'], p['rbv'], p['rbo']])           # (4D,)
    ln = jnp.concatenate([p['lnsw'], p['lnsb'], p['lnrw'], p['lnrb']])          # (4D,)

    # cycle_shift(forward=False) with the PyTorch view-aliasing semantics:
    #   out[i] = h[i+1] for i < L-1, out[L-1] = h[1]   (per batch)
    r = jnp.arange(BL)[:, None]
    c = jnp.arange(BL)[None, :]
    i, j = r % L, c % L
    p_last = (((r // L) == (c // L)) &
              (((i < L - 1) & (j == i + 1)) | ((i == L - 1) & (j == 1)))).astype(f32)
    # block-diagonal head mask: mm(q*k, mask_dd) gives each head's dot product
    # broadcast across that head's HD lanes.
    h_idx = jnp.arange(D)
    mask_dd = ((h_idx[:, None] // HD) == (h_idx[None, :] // HD)).astype(f32)

    slab = jnp.zeros((SLAB_ROWS, LANES), f32)
    slab = slab.at[R_WSAT:R_WSAT + D, :].set(w_sat.astype(f32))
    slab = slab.at[R_WREL:R_WREL + D, :].set(w_rel.astype(f32))
    slab = slab.at[R_FCW:R_FCW + D, :LABEL_NUM].set(p['fcw'].astype(f32))
    slab = slab.at[R_MASK:R_MASK + D, :D].set(mask_dd)
    slab = slab.at[R_PLAST:R_PLAST + BL, :BL].set(p_last)
    slab = slab.at[R_BSAT, :4 * D].set(b_sat.astype(f32))
    slab = slab.at[R_BREL, :4 * D].set(b_rel.astype(f32))
    slab = slab.at[R_LN, :4 * D].set(ln.astype(f32))
    slab = slab.at[R_FCB, :LABEL_NUM].set(p['fcb'].astype(f32))
    return slab


# --------------------------------- kernel ------------------------------------
def _star_kernel(e_ref, slab_ref, out_ref):
    f32 = jnp.float32
    bf16 = jnp.bfloat16

    e2 = e_ref[...]                                                    # (BL, D) f32

    # ---- unpack parameter slab (all slices start on 8-row boundaries) ----
    wsat = slab_ref[R_WSAT:R_WSAT + D, :].astype(bf16)                 # (D, 4D)
    wrel = slab_ref[R_WREL:R_WREL + D, :].astype(bf16)                 # (D, 4D)
    fcw = slab_ref[R_FCW:R_FCW + D, :].astype(bf16)                    # (D, 128) lane-padded
    mask_dd = slab_ref[R_MASK:R_MASK + D, :][:, :D].astype(bf16)       # (D, D)
    p_last = slab_ref[R_PLAST:R_PLAST + BL, :][:, :BL].astype(bf16)    # (BL, BL)
    bsat = slab_ref[R_BSAT:R_BSAT + 1, :]                              # (1, 4D) f32
    brel = slab_ref[R_BREL:R_BREL + 1, :]                              # (1, 4D) f32
    ln = slab_ref[R_LN:R_LN + 1, :]                                    # (1, 4D) f32
    fcb = slab_ref[R_FCB:R_FCB + 1, :]                                 # (1, 128) f32

    lnsw, lnsb = ln[:, 0:D], ln[:, D:2 * D]
    lnrw, lnrb = ln[:, 2 * D:3 * D], ln[:, 3 * D:4 * D]
    w_qkv_s, w_o_s = wsat[:, :D3], wsat[:, D3:]
    b_qkv_s, b_o_s = bsat[:, :D3], bsat[:, D3:]
    w_qkv_r, w_o_r = wrel[:, :D3], wrel[:, D3:]
    b_qkv_r, b_o_r = brel[:, :D3], brel[:, D3:]

    def mm(a, b):
        # bf16 operands (well within the 5e-2 tolerance), f32 MXU accumulation.
        return jnp.dot(a.astype(bf16), b.astype(bf16), preferred_element_type=f32)

    def layernorm(x, w, b):
        u = jnp.mean(x, axis=-1, keepdims=True)
        var = jnp.mean((x - u) ** 2, axis=-1, keepdims=True)
        return w * ((x - u) * lax.rsqrt(var + EPS)) + b

    def bcast_rows(x):                                                 # (B, D) -> (BL, D)
        return jnp.broadcast_to(x.reshape(B, 1, D), (B, L, D)).reshape(BL, D)

    def batch_sum(x):                                                  # (BL, D) -> (B, D)
        return jnp.sum(x.reshape(B, L, D), axis=1)

    h2 = e2                                                            # satellite nodes (BL, D)
    s2 = batch_sum(e2) * (1.0 / L)                                     # relay node (B, D)

    for _ in range(CYCLE_NUM):
        # ---------------------- satellite node update ----------------------
        h_last = mm(p_last, h2)                                        # (BL, D)
        h_next = jnp.broadcast_to(
            h2.reshape(B, L, D)[:, 0:1, :], (B, L, D)).reshape(BL, D)  # cascading copy -> row 0
        s_m = bcast_rows(s2)
        ctx_src = jnp.concatenate([h_last, h2, h_next, e2, s_m], axis=0)   # (5BL, D)

        qkv = mm(ctx_src, w_qkv_s) + b_qkv_s                           # (5BL, 3D)
        q = qkv[BL:2 * BL, 0:D]                                        # query from the h2 block
        k_all = qkv[:, D:2 * D]                                        # (5BL, D)
        v_all = qkv[:, 2 * D:3 * D]                                    # (5BL, D)

        qk = (k_all.reshape(5, BL, D) * q).reshape(5 * BL, D)          # broadcast, no 5-way concat
        sc3 = (mm(qk, mask_dd) * SCALE).reshape(5, BL, D)              # head-broadcast scores
        mx = jnp.max(sc3, axis=0)                                      # per-(row, head) max
        ex = jnp.exp(sc3 - mx)
        inv = pl.reciprocal(jnp.sum(ex, axis=0), approx=True)
        ctx = jnp.sum(ex * v_all.reshape(5, BL, D), axis=0) * inv      # (BL, D)
        h2 = layernorm(jnp.maximum(mm(ctx, w_o_s) + b_o_s, 0.0), lnsw, lnsb)

        # --------------------- relay node update (fused) -------------------
        su = jnp.concatenate([h2, s2], axis=0)                         # (BL+B, D)
        qkv_su = mm(su, w_qkv_r) + b_qkv_r                             # (BL+B, 3D), one matmul
        qr = qkv_su[BL:, 0:D]                                          # (B, D) relay query
        k_su = qkv_su[:, D:2 * D]                                      # (BL+B, D)
        v_su = qkv_su[:, 2 * D:3 * D]                                  # (BL+B, D)
        v_h, v_s = v_su[0:BL, :], v_su[BL:, :]

        q_cat = jnp.concatenate([bcast_rows(qr), qr], axis=0)          # (BL+B, D)
        sc_su = mm(q_cat * k_su, mask_dd) * SCALE                      # (BL+B, D), one matmul
        sc_h, sc_s = sc_su[0:BL, :], sc_su[BL:, :]

        m_b = jnp.maximum(sc_s, jnp.max(sc_h.reshape(B, L, D), axis=1))  # per-(batch, head) max
        e_s = jnp.exp(sc_s - m_b)                                      # (B, D)
        e_h = jnp.exp(sc_h - bcast_rows(m_b))                          # (BL, D)
        inv_r = pl.reciprocal(e_s + batch_sum(e_h), approx=True)       # (B, D)
        ctx_r = (e_s * v_s + batch_sum(e_h * v_h)) * inv_r             # (B, D)
        s2 = layernorm(jnp.maximum(mm(ctx_r, w_o_r) + b_o_r, 0.0), lnrw, lnrb)

    # ------------------------------ classifier ------------------------------
    feat = batch_sum(h2) * (1.0 / L) + s2                              # (B, D)
    logits = mm(feat, fcw) + fcb                                       # (B, 128) lane-padded
    out_ref[...] = jnp.zeros((8, LANES), f32)                          # lane-dense (8,128) block
    out_ref[0:B, :] = logits


# -------------------------------- wrapper -------------------------------------
def star_transformer_classifier(e, p):
    """e: (B, L, D) embedded tokens; p: dict of weight arrays (PyTorch layout)."""
    e2 = e.reshape(B * L, D).astype(jnp.float32)
    slab = _build_param_slab(p)                                        # single parameter DMA
    out_pad = pl.pallas_call(
        _star_kernel,
        out_shape=jax.ShapeDtypeStruct((8, LANES), jnp.float32),
        in_specs=[pl.BlockSpec(memory_space=pltpu.MemorySpace.VMEM)] * 2,
        out_specs=pl.BlockSpec(memory_space=pltpu.MemorySpace.VMEM),
    )(e2, slab)
    return out_pad[:B, :LABEL_NUM]


# --------------------------- pure-JAX reference --------------------------------
def reference_forward(e, p):
    def linear(x, W, b):
        return jnp.einsum('...i,io->...o', x, W, precision=lax.Precision.HIGHEST) + b

    def layernorm(x, w, b):
        u = jnp.mean(x, axis=-1, keepdims=True)
        var = jnp.mean((x - u) ** 2, axis=-1, keepdims=True)
        return w * (x - u) / jnp.sqrt(var + EPS) + b

    def attention(q, k, v, wq, bq, wk, bk, wv, bv, wo, bo):
        Q, K, V = linear(q, wq, bq), linear(k, wk, bk), linear(v, wv, bv)
        N, Lq, _ = Q.shape
        Lk = K.shape[1]
        Qh = Q.reshape(N, Lq, H, HD).transpose(0, 2, 1, 3)
        Kh = K.reshape(N, Lk, H, HD).transpose(0, 2, 1, 3)
        Vh = V.reshape(N, Lk, H, HD).transpose(0, 2, 1, 3)
        sc = jnp.einsum('nhqd,nhkd->nhqk', Qh, Kh,
                        precision=lax.Precision.HIGHEST) / math.sqrt(HD)
        pr = jax.nn.softmax(sc, axis=-1)
        ctx = jnp.einsum('nhqk,nhkd->nhqd', pr, Vh, precision=lax.Precision.HIGHEST)
        ctx = ctx.transpose(0, 2, 1, 3).reshape(N, Lq, D)
        return linear(ctx, wo, bo)

    h = e
    s = jnp.mean(e, axis=1)
    for _ in range(CYCLE_NUM):
        # replicate the in-place / view-aliasing cycle_shift semantics
        h_next = jnp.broadcast_to(h[:, 0:1, :], (B, L, D))
        h_last = jnp.concatenate([h[:, 1:, :], h[:, 1:2, :]], axis=1)
        s_m = jnp.broadcast_to(s[:, None, :], (B, L, D))
        c = jnp.stack([h_last, h, h_next, e, s_m], axis=-2).reshape(B * L, 5, D)
        hq = h.reshape(B * L, 1, D)
        sat = attention(hq, c, c, p['swq'], p['sbq'], p['swk'], p['sbk'],
                        p['swv'], p['sbv'], p['swo'], p['sbo'])
        h = layernorm(jax.nn.relu(sat), p['lnsw'], p['lnsb']).reshape(B, L, D)
        sq = s[:, None, :]
        m_c = jnp.concatenate([sq, h], axis=1)
        rel = attention(sq, m_c, m_c, p['rwq'], p['rbq'], p['rwk'], p['rbk'],
                        p['rwv'], p['rbv'], p['rwo'], p['rbo'])
        s = layernorm(jax.nn.relu(rel), p['lnrw'], p['lnrb'])[:, 0, :]
    h_mean = jnp.mean(h, axis=1)
    return jnp.einsum('bd,dl->bl', h_mean + s, p['fcw'],
                      precision=lax.Precision.HIGHEST) + p['fcb']


# ----------------------------------- main --------------------------------------
if __name__ == "__main__":
    key = jax.random.PRNGKey(0)
    k_emb, k_tok, kq, kk, kv, ko, kfc = jax.random.split(key, 7)

    def lin_init(k, din, dout):
        bound = 1.0 / math.sqrt(din)
        kw, kb = jax.random.split(k)
        W = jax.random.uniform(kw, (din, dout), jnp.float32, -bound, bound)
        b = jax.random.uniform(kb, (dout,), jnp.float32, -bound, bound)
        return W, b

    emb_table = jax.random.normal(k_emb, (V_SIZE, D), jnp.float32)   # nn.Embedding ~ N(0,1)
    tokens = jax.random.randint(k_tok, (B, L), 0, V_SIZE)            # module input x

    swq, sbq = lin_init(kq, D, D)
    swk, sbk = lin_init(kk, D, D)
    swv, sbv = lin_init(kv, D, D)
    swo, sbo = lin_init(ko, D, D)
    # relay MultiAttention / LayerNorm are deepcopies of the satellite ones at init
    rwq, rbq, rwk, rbk, rwv, rbv, rwo, rbo = swq, sbq, swk, sbk, swv, sbv, swo, sbo
    lnsw, lnsb = jnp.ones((D,), jnp.float32), jnp.zeros((D,), jnp.float32)
    lnrw, lnrb = lnsw, lnsb
    fcw, fcb = lin_init(kfc, D, LABEL_NUM)

    # embedding lookup (glue, outside the kernel)
    e = emb_table[tokens]                                            # (B, L, D)

    params = dict(swq=swq, sbq=sbq, swk=swk, sbk=sbk, swv=swv, sbv=sbv,
                  swo=swo, sbo=sbo, rwq=rwq, rbq=rbq, rwk=rwk, rbk=rbk,
                  rwv=rwv, rbv=rbv, rwo=rwo, rbo=rbo,
                  lnsw=lnsw, lnsb=lnsb, lnrw=lnrw, lnrb=lnrb,
                  fcw=fcw, fcb=fcb)

    logits = star_transformer_classifier(e, params)
    logits = jax.block_until_ready(logits)

    ref = reference_forward(e, params)

    assert logits.shape == (B, LABEL_NUM)
    assert bool(jnp.all(jnp.isfinite(logits)))
    assert jnp.allclose(logits, ref, atol=5e-2, rtol=5e-2), (logits, ref)
    print("KERNEL_OK")
</pallas_src>

<mosaic_0001>
module attributes {stable_mosaic.version = 11 : i64} {
  func.func @_star_kernel(%arg0: memref<16x32xf32, #tpu.memory_space<vmem>>, %arg1: memref<176x128xf32, #tpu.memory_space<vmem>>, %arg2: memref<8x128xf32, #tpu.memory_space<vmem>>) attributes {dimension_semantics = [], scalar_prefetch = 0 : i64, scratch_operands = 0 : i64, tpu.core_type = #tpu.core_type<tc>} {
    %c0 = arith.constant 0 : index
    %c0_0 = arith.constant 0 : index
    %0 = vector.load %arg0[%c0, %c0_0] : memref<16x32xf32, #tpu.memory_space<vmem>>, vector<16x32xf32>
    %c0_1 = arith.constant 0 : index
    %c0_2 = arith.constant 0 : index
    %1 = vector.load %arg1[%c0_1, %c0_2] : memref<176x128xf32, #tpu.memory_space<vmem>>, vector<32x128xf32>
    %2 = arith.truncf %1 : vector<32x128xf32> to vector<32x128xbf16>
    %c32 = arith.constant 32 : index
    %c0_3 = arith.constant 0 : index
    %3 = vector.load %arg1[%c32, %c0_3] : memref<176x128xf32, #tpu.memory_space<vmem>>, vector<32x128xf32>
    %4 = arith.truncf %3 : vector<32x128xf32> to vector<32x128xbf16>
    %c64 = arith.constant 64 : index
    %c0_4 = arith.constant 0 : index
    %5 = vector.load %arg1[%c64, %c0_4] : memref<176x128xf32, #tpu.memory_space<vmem>>, vector<32x128xf32>
    %6 = arith.truncf %5 : vector<32x128xf32> to vector<32x128xbf16>
    %c96 = arith.constant 96 : index
    %c0_5 = arith.constant 0 : index
    %7 = vector.load %arg1[%c96, %c0_5] : memref<176x128xf32, #tpu.memory_space<vmem>>, vector<32x128xf32>
    %8 = vector.extract_strided_slice %7 {offsets = [0, 0], sizes = [32, 32], strides = [1, 1]} : vector<32x128xf32> to vector<32x32xf32>
    %9 = arith.truncf %8 : vector<32x32xf32> to vector<32x32xbf16>
    %c128 = arith.constant 128 : index
    %c0_6 = arith.constant 0 : index
    %10 = vector.load %arg1[%c128, %c0_6] : memref<176x128xf32, #tpu.memory_space<vmem>>, vector<16x128xf32>
    %11 = vector.extract_strided_slice %10 {offsets = [0, 0], sizes = [16, 16], strides = [1, 1]} : vector<16x128xf32> to vector<16x16xf32>
    %12 = arith.truncf %11 : vector<16x16xf32> to vector<16x16xbf16>
    %c144 = arith.constant 144 : index
    %c0_7 = arith.constant 0 : index
    %13 = vector.load %arg1[%c144, %c0_7] : memref<176x128xf32, #tpu.memory_space<vmem>>, vector<1x128xf32>
    %c152 = arith.constant 152 : index
    %c0_8 = arith.constant 0 : index
    %14 = vector.load %arg1[%c152, %c0_8] : memref<176x128xf32, #tpu.memory_space<vmem>>, vector<1x128xf32>
    %c160 = arith.constant 160 : index
    %c0_9 = arith.constant 0 : index
    %15 = vector.load %arg1[%c160, %c0_9] : memref<176x128xf32, #tpu.memory_space<vmem>>, vector<1x128xf32>
    %c168 = arith.constant 168 : index
    %c0_10 = arith.constant 0 : index
    %16 = vector.load %arg1[%c168, %c0_10] : memref<176x128xf32, #tpu.memory_space<vmem>>, vector<1x128xf32>
    %17 = vector.extract_strided_slice %15 {offsets = [0, 0], sizes = [1, 32], strides = [1, 1]} : vector<1x128xf32> to vector<1x32xf32>
    %18 = vector.extract_strided_slice %15 {offsets = [0, 32], sizes = [1, 32], strides = [1, 1]} : vector<1x128xf32> to vector<1x32xf32>
    %19 = vector.extract_strided_slice %15 {offsets = [0, 64], sizes = [1, 32], strides = [1, 1]} : vector<1x128xf32> to vector<1x32xf32>
    %20 = vector.extract_strided_slice %15 {offsets = [0, 96], sizes = [1, 32], strides = [1, 1]} : vector<1x128xf32> to vector<1x32xf32>
    %21 = vector.extract_strided_slice %2 {offsets = [0, 0], sizes = [32, 96], strides = [1, 1]} : vector<32x128xbf16> to vector<32x96xbf16>
    %22 = vector.extract_strided_slice %2 {offsets = [0, 96], sizes = [32, 32], strides = [1, 1]} : vector<32x128xbf16> to vector<32x32xbf16>
    %23 = vector.extract_strided_slice %13 {offsets = [0, 0], sizes = [1, 96], strides = [1, 1]} : vector<1x128xf32> to vector<1x96xf32>
    %24 = vector.extract_strided_slice %13 {offsets = [0, 96], sizes = [1, 32], strides = [1, 1]} : vector<1x128xf32> to vector<1x32xf32>
    %25 = vector.extract_strided_slice %4 {offsets = [0, 0], sizes = [32, 96], strides = [1, 1]} : vector<32x128xbf16> to vector<32x96xbf16>
    %26 = vector.extract_strided_slice %4 {offsets = [0, 96], sizes = [32, 32], strides = [1, 1]} : vector<32x128xbf16> to vector<32x32xbf16>
    %27 = vector.extract_strided_slice %14 {offsets = [0, 0], sizes = [1, 96], strides = [1, 1]} : vector<1x128xf32> to vector<1x96xf32>
    %28 = vector.extract_strided_slice %14 {offsets = [0, 96], sizes = [1, 32], strides = [1, 1]} : vector<1x128xf32> to vector<1x32xf32>
    %29 = vector.shape_cast %0 : vector<16x32xf32> to vector<2x8x32xf32>
    %cst = arith.constant dense<0.000000e+00> : vector<2x32xf32>
    %30 = vector.multi_reduction <add>, %29, %cst [1] : vector<2x8x32xf32> to vector<2x32xf32>
    %cst_11 = arith.constant 1.250000e-01 : f32
    %31 = vector.broadcast %cst_11 : f32 to vector<2x32xf32>
    %32 = arith.mulf %30, %31 : vector<2x32xf32>
    %33 = arith.truncf %0 : vector<16x32xf32> to vector<16x32xbf16>
    %cst_12 = arith.constant dense<0.000000e+00> : vector<16x32xf32>
    %34 = tpu.matmul %12, %33, %cst_12 {dimension_numbers = #tpu.dot_dimension_numbers<[1], [0], [0], [1], [0, 0, 1, 1], [], []>} : vector<16x16xbf16>, vector<16x32xbf16>, vector<16x32xf32> -> vector<16x32xf32>
    %35 = vector.shape_cast %0 : vector<16x32xf32> to vector<2x8x32xf32>
    %36 = vector.extract_strided_slice %35 {offsets = [0, 0, 0], sizes = [2, 1, 32], strides = [1, 1, 1]} : vector<2x8x32xf32> to vector<2x1x32xf32>
    %37 = vector.shape_cast %36 : vector<2x1x32xf32> to vector<2x1x32xf32>
    %38 = vector.broadcast %37 : vector<2x1x32xf32> to vector<2x8x32xf32>
    %39 = vector.shape_cast %38 : vector<2x8x32xf32> to vector<16x32xf32>
    %40 = vector.shape_cast %32 : vector<2x32xf32> to vector<2x1x32xf32>
    %41 = vector.shape_cast %40 : vector<2x1x32xf32> to vector<2x1x32xf32>
    %42 = vector.broadcast %41 : vector<2x1x32xf32> to vector<2x8x32xf32>
    %43 = vector.shape_cast %42 : vector<2x8x32xf32> to vector<16x32xf32>
    %44 = tpu.concatenate %34, %0, %39, %0, %43 in 0 : vector<16x32xf32>, vector<16x32xf32>, vector<16x32xf32>, vector<16x32xf32>, vector<16x32xf32> -> vector<80x32xf32>
    %45 = arith.truncf %44 : vector<80x32xf32> to vector<80x32xbf16>
    %cst_13 = arith.constant dense<0.000000e+00> : vector<80x96xf32>
    %46 = tpu.matmul %45, %21, %cst_13 {dimension_numbers = #tpu.dot_dimension_numbers<[1], [0], [0], [1], [0, 0, 1, 1], [], []>} : vector<80x32xbf16>, vector<32x96xbf16>, vector<80x96xf32> -> vector<80x96xf32>
    %47 = vector.broadcast %23 : vector<1x96xf32> to vector<80x96xf32>
    %48 = arith.addf %46, %47 : vector<80x96xf32>
    %49 = vector.extract_strided_slice %48 {offsets = [16, 0], sizes = [16, 32], strides = [1, 1]} : vector<80x96xf32> to vector<16x32xf32>
    %50 = vector.extract_strided_slice %48 {offsets = [0, 32], sizes = [80, 32], strides = [1, 1]} : vector<80x96xf32> to vector<80x32xf32>
    %51 = vector.extract_strided_slice %48 {offsets = [0, 64], sizes = [80, 32], strides = [1, 1]} : vector<80x96xf32> to vector<80x32xf32>
    %52 = vector.shape_cast %50 : vector<80x32xf32> to vector<5x16x32xf32>
    %53 = vector.shape_cast %49 : vector<16x32xf32> to vector<1x16x32xf32>
    %54 = vector.broadcast %53 : vector<1x16x32xf32> to vector<5x16x32xf32>
    %55 = arith.mulf %52, %54 : vector<5x16x32xf32>
    %56 = vector.shape_cast %55 : vector<5x16x32xf32> to vector<80x32xf32>
    %57 = arith.truncf %56 : vector<80x32xf32> to vector<80x32xbf16>
    %cst_14 = arith.constant dense<0.000000e+00> : vector<80x32xf32>
    %58 = tpu.matmul %57, %9, %cst_14 {dimension_numbers = #tpu.dot_dimension_numbers<[1], [0], [0], [1], [0, 0, 1, 1], [], []>} : vector<80x32xbf16>, vector<32x32xbf16>, vector<80x32xf32> -> vector<80x32xf32>
    %cst_15 = arith.constant 0.353553385 : f32
    %59 = vector.broadcast %cst_15 : f32 to vector<80x32xf32>
    %60 = arith.mulf %58, %59 : vector<80x32xf32>
    %61 = vector.shape_cast %60 : vector<80x32xf32> to vector<5x16x32xf32>
    %cst_16 = arith.constant dense<0xFF800000> : vector<16x32xf32>
    %62 = vector.multi_reduction <maximumf>, %61, %cst_16 [0] : vector<5x16x32xf32> to vector<16x32xf32>
    %63 = vector.shape_cast %62 : vector<16x32xf32> to vector<1x16x32xf32>
    %64 = vector.broadcast %63 : vector<1x16x32xf32> to vector<5x16x32xf32>
    %65 = arith.subf %61, %64 : vector<5x16x32xf32>
    %66 = math.exp %65 : vector<5x16x32xf32>
    %cst_17 = arith.constant dense<0.000000e+00> : vector<16x32xf32>
    %67 = vector.multi_reduction <add>, %66, %cst_17 [0] : vector<5x16x32xf32> to vector<16x32xf32>
    %68 = tpu.reciprocal %67 {approx = true} : vector<16x32xf32> -> vector<16x32xf32>
    %69 = vector.shape_cast %51 : vector<80x32xf32> to vector<5x16x32xf32>
    %70 = arith.mulf %66, %69 : vector<5x16x32xf32>
    %cst_18 = arith.constant dense<0.000000e+00> : vector<16x32xf32>
    %71 = vector.multi_reduction <add>, %70, %cst_18 [0] : vector<5x16x32xf32> to vector<16x32xf32>
    %72 = arith.mulf %71, %68 : vector<16x32xf32>
    %73 = arith.truncf %72 : vector<16x32xf32> to vector<16x32xbf16>
    %cst_19 = arith.constant dense<0.000000e+00> : vector<16x32xf32>
    %74 = tpu.matmul %73, %22, %cst_19 {dimension_numbers = #tpu.dot_dimension_numbers<[1], [0], [0], [1], [0, 0, 1, 1], [], []>} : vector<16x32xbf16>, vector<32x32xbf16>, vector<16x32xf32> -> vector<16x32xf32>
    %75 = vector.broadcast %24 : vector<1x32xf32> to vector<16x32xf32>
    %76 = arith.addf %74, %75 : vector<16x32xf32>
    %cst_20 = arith.constant 0.000000e+00 : f32
    %77 = vector.broadcast %cst_20 : f32 to vector<16x32xf32>
    %78 = arith.maximumf %76, %77 : vector<16x32xf32>
    %cst_21 = arith.constant dense<0.000000e+00> : vector<16xf32>
    %79 = vector.multi_reduction <add>, %78, %cst_21 [1] : vector<16x32xf32> to vector<16xf32>
    %80 = vector.shape_cast %79 : vector<16xf32> to vector<16x1xf32>
    %cst_22 = arith.constant 3.200000e+01 : f32
    %81 = vector.broadcast %cst_22 : f32 to vector<16x1xf32>
    %82 = arith.divf %80, %81 : vector<16x1xf32>
    %83 = vector.broadcast %82 : vector<16x1xf32> to vector<16x32xf32>
    %84 = arith.subf %78, %83 : vector<16x32xf32>
    %85 = arith.mulf %84, %84 : vector<16x32xf32>
    %cst_23 = arith.constant dense<0.000000e+00> : vector<16xf32>
    %86 = vector.multi_reduction <add>, %85, %cst_23 [1] : vector<16x32xf32> to vector<16xf32>
    %87 = vector.shape_cast %86 : vector<16xf32> to vector<16x1xf32>
    %cst_24 = arith.constant 3.200000e+01 : f32
    %88 = vector.broadcast %cst_24 : f32 to vector<16x1xf32>
    %89 = arith.divf %87, %88 : vector<16x1xf32>
    %90 = vector.broadcast %82 : vector<16x1xf32> to vector<16x32xf32>
    %91 = arith.subf %78, %90 : vector<16x32xf32>
    %cst_25 = arith.constant 9.99999996E-13 : f32
    %92 = vector.broadcast %cst_25 : f32 to vector<16x1xf32>
    %93 = arith.addf %89, %92 : vector<16x1xf32>
    %94 = math.rsqrt %93 : vector<16x1xf32>
    %95 = vector.broadcast %94 : vector<16x1xf32> to vector<16x32xf32>
    %96 = arith.mulf %91, %95 : vector<16x32xf32>
    %97 = vector.broadcast %17 : vector<1x32xf32> to vector<16x32xf32>
    %98 = arith.mulf %97, %96 : vector<16x32xf32>
    %99 = vector.broadcast %18 : vector<1x32xf32> to vector<16x32xf32>
    %100 = arith.addf %98, %99 : vector<16x32xf32>
    %101 = tpu.concatenate %100, %32 in 0 : vector<16x32xf32>, vector<2x32xf32> -> vector<18x32xf32>
    %102 = arith.truncf %101 : vector<18x32xf32> to vector<18x32xbf16>
    %cst_26 = arith.constant dense<0.000000e+00> : vector<18x96xf32>
    %103 = tpu.matmul %102, %25, %cst_26 {dimension_numbers = #tpu.dot_dimension_numbers<[1], [0], [0], [1], [0, 0, 1, 1], [], []>} : vector<18x32xbf16>, vector<32x96xbf16>, vector<18x96xf32> -> vector<18x96xf32>
    %104 = vector.broadcast %27 : vector<1x96xf32> to vector<18x96xf32>
    %105 = arith.addf %103, %104 : vector<18x96xf32>
    %106 = vector.extract_strided_slice %105 {offsets = [16, 0], sizes = [2, 32], strides = [1, 1]} : vector<18x96xf32> to vector<2x32xf32>
    %107 = vector.extract_strided_slice %105 {offsets = [0, 32], sizes = [18, 32], strides = [1, 1]} : vector<18x96xf32> to vector<18x32xf32>
    %108 = vector.extract_strided_slice %105 {offsets = [0, 64], sizes = [18, 32], strides = [1, 1]} : vector<18x96xf32> to vector<18x32xf32>
    %109 = vector.extract_strided_slice %108 {offsets = [0, 0], sizes = [16, 32], strides = [1, 1]} : vector<18x32xf32> to vector<16x32xf32>
    %110 = vector.extract_strided_slice %108 {offsets = [16, 0], sizes = [2, 32], strides = [1, 1]} : vector<18x32xf32> to vector<2x32xf32>
    %111 = vector.shape_cast %106 : vector<2x32xf32> to vector<2x1x32xf32>
    %112 = vector.shape_cast %111 : vector<2x1x32xf32> to vector<2x1x32xf32>
    %113 = vector.broadcast %112 : vector<2x1x32xf32> to vector<2x8x32xf32>
    %114 = vector.shape_cast %113 : vector<2x8x32xf32> to vector<16x32xf32>
    %115 = tpu.concatenate %114, %106 in 0 : vector<16x32xf32>, vector<2x32xf32> -> vector<18x32xf32>
    %116 = arith.mulf %115, %107 : vector<18x32xf32>
    %117 = arith.truncf %116 : vector<18x32xf32> to vector<18x32xbf16>
    %cst_27 = arith.constant dense<0.000000e+00> : vector<18x32xf32>
    %118 = tpu.matmul %117, %9, %cst_27 {dimension_numbers = #tpu.dot_dimension_numbers<[1], [0], [0], [1], [0, 0, 1, 1], [], []>} : vector<18x32xbf16>, vector<32x32xbf16>, vector<18x32xf32> -> vector<18x32xf32>
    %cst_28 = arith.constant 0.353553385 : f32
    %119 = vector.broadcast %cst_28 : f32 to vector<18x32xf32>
    %120 = arith.mulf %118, %119 : vector<18x32xf32>
    %121 = vector.extract_strided_slice %120 {offsets = [0, 0], sizes = [16, 32], strides = [1, 1]} : vector<18x32xf32> to vector<16x32xf32>
    %122 = vector.extract_strided_slice %120 {offsets = [16, 0], sizes = [2, 32], strides = [1, 1]} : vector<18x32xf32> to vector<2x32xf32>
    %123 = vector.shape_cast %121 : vector<16x32xf32> to vector<2x8x32xf32>
    %cst_29 = arith.constant dense<0xFF800000> : vector<2x32xf32>
    %124 = vector.multi_reduction <maximumf>, %123, %cst_29 [1] : vector<2x8x32xf32> to vector<2x32xf32>
    %125 = arith.maximumf %122, %124 : vector<2x32xf32>
    %126 = arith.subf %122, %125 : vector<2x32xf32>
    %127 = math.exp %126 : vector<2x32xf32>
    %128 = vector.shape_cast %125 : vector<2x32xf32> to vector<2x1x32xf32>
    %129 = vector.shape_cast %128 : vector<2x1x32xf32> to vector<2x1x32xf32>
    %130 = vector.broadcast %129 : vector<2x1x32xf32> to vector<2x8x32xf32>
    %131 = vector.shape_cast %130 : vector<2x8x32xf32> to vector<16x32xf32>
    %132 = arith.subf %121, %131 : vector<16x32xf32>
    %133 = math.exp %132 : vector<16x32xf32>
    %134 = vector.shape_cast %133 : vector<16x32xf32> to vector<2x8x32xf32>
    %cst_30 = arith.constant dense<0.000000e+00> : vector<2x32xf32>
    %135 = vector.multi_reduction <add>, %134, %cst_30 [1] : vector<2x8x32xf32> to vector<2x32xf32>
    %136 = arith.addf %127, %135 : vector<2x32xf32>
    %137 = tpu.reciprocal %136 {approx = true} : vector<2x32xf32> -> vector<2x32xf32>
    %138 = arith.mulf %127, %110 : vector<2x32xf32>
    %139 = arith.mulf %133, %109 : vector<16x32xf32>
    %140 = vector.shape_cast %139 : vector<16x32xf32> to vector<2x8x32xf32>
    %cst_31 = arith.constant dense<0.000000e+00> : vector<2x32xf32>
    %141 = vector.multi_reduction <add>, %140, %cst_31 [1] : vector<2x8x32xf32> to vector<2x32xf32>
    %142 = arith.addf %138, %141 : vector<2x32xf32>
    %143 = arith.mulf %142, %137 : vector<2x32xf32>
    %144 = arith.truncf %143 : vector<2x32xf32> to vector<2x32xbf16>
    %cst_32 = arith.constant dense<0.000000e+00> : vector<2x32xf32>
    %145 = tpu.matmul %144, %26, %cst_32 {dimension_numbers = #tpu.dot_dimension_numbers<[1], [0], [0], [1], [0, 0, 1, 1], [], []>} : vector<2x32xbf16>, vector<32x32xbf16>, vector<2x32xf32> -> vector<2x32xf32>
    %146 = vector.broadcast %28 : vector<1x32xf32> to vector<2x32xf32>
    %147 = arith.addf %145, %146 : vector<2x32xf32>
    %cst_33 = arith.constant 0.000000e+00 : f32
    %148 = vector.broadcast %cst_33 : f32 to vector<2x32xf32>
    %149 = arith.maximumf %147, %148 : vector<2x32xf32>
    %cst_34 = arith.constant dense<0.000000e+00> : vector<2xf32>
    %150 = vector.multi_reduction <add>, %149, %cst_34 [1] : vector<2x32xf32> to vector<2xf32>
    %151 = vector.shape_cast %150 : vector<2xf32> to vector<2x1xf32>
    %cst_35 = arith.constant 3.200000e+01 : f32
    %152 = vector.broadcast %cst_35 : f32 to vector<2x1xf32>
    %153 = arith.divf %151, %152 : vector<2x1xf32>
    %154 = vector.broadcast %153 : vector<2x1xf32> to vector<2x32xf32>
    %155 = arith.subf %149, %154 : vector<2x32xf32>
    %156 = arith.mulf %155, %155 : vector<2x32xf32>
    %cst_36 = arith.constant dense<0.000000e+00> : vector<2xf32>
    %157 = vector.multi_reduction <add>, %156, %cst_36 [1] : vector<2x32xf32> to vector<2xf32>
    %158 = vector.shape_cast %157 : vector<2xf32> to vector<2x1xf32>
    %cst_37 = arith.constant 3.200000e+01 : f32
    %159 = vector.broadcast %cst_37 : f32 to vector<2x1xf32>
    %160 = arith.divf %158, %159 : vector<2x1xf32>
    %161 = vector.broadcast %153 : vector<2x1xf32> to vector<2x32xf32>
    %162 = arith.subf %149, %161 : vector<2x32xf32>
    %cst_38 = arith.constant 9.99999996E-13 : f32
    %163 = vector.broadcast %cst_38 : f32 to vector<2x1xf32>
    %164 = arith.addf %160, %163 : vector<2x1xf32>
    %165 = math.rsqrt %164 : vector<2x1xf32>
    %166 = vector.broadcast %165 : vector<2x1xf32> to vector<2x32xf32>
    %167 = arith.mulf %162, %166 : vector<2x32xf32>
    %168 = vector.broadcast %19 : vector<1x32xf32> to vector<2x32xf32>
    %169 = arith.mulf %168, %167 : vector<2x32xf32>
    %170 = vector.broadcast %20 : vector<1x32xf32> to vector<2x32xf32>
    %171 = arith.addf %169, %170 : vector<2x32xf32>
    %172 = arith.truncf %100 : vector<16x32xf32> to vector<16x32xbf16>
    %cst_39 = arith.constant dense<0.000000e+00> : vector<16x32xf32>
    %173 = tpu.matmul %12, %172, %cst_39 {dimension_numbers = #tpu.dot_dimension_numbers<[1], [0], [0], [1], [0, 0, 1, 1], [], []>} : vector<16x16xbf16>, vector<16x32xbf16>, vector<16x32xf32> -> vector<16x32xf32>
    %174 = vector.shape_cast %100 : vector<16x32xf32> to vector<2x8x32xf32>
    %175 = vector.extract_strided_slice %174 {offsets = [0, 0, 0], sizes = [2, 1, 32], strides = [1, 1, 1]} : vector<2x8x32xf32> to vector<2x1x32xf32>
    %176 = vector.shape_cast %175 : vector<2x1x32xf32> to vector<2x1x32xf32>
    %177 = vector.broadcast %176 : vector<2x1x32xf32> to vector<2x8x32xf32>
    %178 = vector.shape_cast %177 : vector<2x8x32xf32> to vector<16x32xf32>
    %179 = vector.shape_cast %171 : vector<2x32xf32> to vector<2x1x32xf32>
    %180 = vector.shape_cast %179 : vector<2x1x32xf32> to vector<2x1x32xf32>
    %181 = vector.broadcast %180 : vector<2x1x32xf32> to vector<2x8x32xf32>
    %182 = vector.shape_cast %181 : vector<2x8x32xf32> to vector<16x32xf32>
    %183 = tpu.concatenate %173, %100, %178, %0, %182 in 0 : vector<16x32xf32>, vector<16x32xf32>, vector<16x32xf32>, vector<16x32xf32>, vector<16x32xf32> -> vector<80x32xf32>
    %184 = arith.truncf %183 : vector<80x32xf32> to vector<80x32xbf16>
    %cst_40 = arith.constant dense<0.000000e+00> : vector<80x96xf32>
    %185 = tpu.matmul %184, %21, %cst_40 {dimension_numbers = #tpu.dot_dimension_numbers<[1], [0], [0], [1], [0, 0, 1, 1], [], []>} : vector<80x32xbf16>, vector<32x96xbf16>, vector<80x96xf32> -> vector<80x96xf32>
    %186 = vector.broadcast %23 : vector<1x96xf32> to vector<80x96xf32>
    %187 = arith.addf %185, %186 : vector<80x96xf32>
    %188 = vector.extract_strided_slice %187 {offsets = [16, 0], sizes = [16, 32], strides = [1, 1]} : vector<80x96xf32> to vector<16x32xf32>
    %189 = vector.extract_strided_slice %187 {offsets = [0, 32], sizes = [80, 32], strides = [1, 1]} : vector<80x96xf32> to vector<80x32xf32>
    %190 = vector.extract_strided_slice %187 {offsets = [0, 64], sizes = [80, 32], strides = [1, 1]} : vector<80x96xf32> to vector<80x32xf32>
    %191 = vector.shape_cast %189 : vector<80x32xf32> to vector<5x16x32xf32>
    %192 = vector.shape_cast %188 : vector<16x32xf32> to vector<1x16x32xf32>
    %193 = vector.broadcast %192 : vector<1x16x32xf32> to vector<5x16x32xf32>
    %194 = arith.mulf %191, %193 : vector<5x16x32xf32>
    %195 = vector.shape_cast %194 : vector<5x16x32xf32> to vector<80x32xf32>
    %196 = arith.truncf %195 : vector<80x32xf32> to vector<80x32xbf16>
    %cst_41 = arith.constant dense<0.000000e+00> : vector<80x32xf32>
    %197 = tpu.matmul %196, %9, %cst_41 {dimension_numbers = #tpu.dot_dimension_numbers<[1], [0], [0], [1], [0, 0, 1, 1], [], []>} : vector<80x32xbf16>, vector<32x32xbf16>, vector<80x32xf32> -> vector<80x32xf32>
    %cst_42 = arith.constant 0.353553385 : f32
    %198 = vector.broadcast %cst_42 : f32 to vector<80x32xf32>
    %199 = arith.mulf %197, %198 : vector<80x32xf32>
    %200 = vector.shape_cast %199 : vector<80x32xf32> to vector<5x16x32xf32>
    %cst_43 = arith.constant dense<0xFF800000> : vector<16x32xf32>
    %201 = vector.multi_reduction <maximumf>, %200, %cst_43 [0] : vector<5x16x32xf32> to vector<16x32xf32>
    %202 = vector.shape_cast %201 : vector<16x32xf32> to vector<1x16x32xf32>
    %203 = vector.broadcast %202 : vector<1x16x32xf32> to vector<5x16x32xf32>
    %204 = arith.subf %200, %203 : vector<5x16x32xf32>
    %205 = math.exp %204 : vector<5x16x32xf32>
    %cst_44 = arith.constant dense<0.000000e+00> : vector<16x32xf32>
    %206 = vector.multi_reduction <add>, %205, %cst_44 [0] : vector<5x16x32xf32> to vector<16x32xf32>
    %207 = tpu.reciprocal %206 {approx = true} : vector<16x32xf32> -> vector<16x32xf32>
    %208 = vector.shape_cast %190 : vector<80x32xf32> to vector<5x16x32xf32>
    %209 = arith.mulf %205, %208 : vector<5x16x32xf32>
    %cst_45 = arith.constant dense<0.000000e+00> : vector<16x32xf32>
    %210 = vector.multi_reduction <add>, %209, %cst_45 [0] : vector<5x16x32xf32> to vector<16x32xf32>
    %211 = arith.mulf %210, %207 : vector<16x32xf32>
    %212 = arith.truncf %211 : vector<16x32xf32> to vector<16x32xbf16>
    %cst_46 = arith.constant dense<0.000000e+00> : vector<16x32xf32>
    %213 = tpu.matmul %212, %22, %cst_46 {dimension_numbers = #tpu.dot_dimension_numbers<[1], [0], [0], [1], [0, 0, 1, 1], [], []>} : vector<16x32xbf16>, vector<32x32xbf16>, vector<16x32xf32> -> vector<16x32xf32>
    %214 = vector.broadcast %24 : vector<1x32xf32> to vector<16x32xf32>
    %215 = arith.addf %213, %214 : vector<16x32xf32>
    %cst_47 = arith.constant 0.000000e+00 : f32
    %216 = vector.broadcast %cst_47 : f32 to vector<16x32xf32>
    %217 = arith.maximumf %215, %216 : vector<16x32xf32>
    %cst_48 = arith.constant dense<0.000000e+00> : vector<16xf32>
    %218 = vector.multi_reduction <add>, %217, %cst_48 [1] : vector<16x32xf32> to vector<16xf32>
    %219 = vector.shape_cast %218 : vector<16xf32> to vector<16x1xf32>
    %cst_49 = arith.constant 3.200000e+01 : f32
    %220 = vector.broadcast %cst_49 : f32 to vector<16x1xf32>
    %221 = arith.divf %219, %220 : vector<16x1xf32>
    %222 = vector.broadcast %221 : vector<16x1xf32> to vector<16x32xf32>
    %223 = arith.subf %217, %222 : vector<16x32xf32>
    %224 = arith.mulf %223, %223 : vector<16x32xf32>
    %cst_50 = arith.constant dense<0.000000e+00> : vector<16xf32>
    %225 = vector.multi_reduction <add>, %224, %cst_50 [1] : vector<16x32xf32> to vector<16xf32>
    %226 = vector.shape_cast %225 : vector<16xf32> to vector<16x1xf32>
    %cst_51 = arith.constant 3.200000e+01 : f32
    %227 = vector.broadcast %cst_51 : f32 to vector<16x1xf32>
    %228 = arith.divf %226, %227 : vector<16x1xf32>
    %229 = vector.broadcast %221 : vector<16x1xf32> to vector<16x32xf32>
    %230 = arith.subf %217, %229 : vector<16x32xf32>
    %cst_52 = arith.constant 9.99999996E-13 : f32
    %231 = vector.broadcast %cst_52 : f32 to vector<16x1xf32>
    %232 = arith.addf %228, %231 : vector<16x1xf32>
    %233 = math.rsqrt %232 : vector<16x1xf32>
    %234 = vector.broadcast %233 : vector<16x1xf32> to vector<16x32xf32>
    %235 = arith.mulf %230, %234 : vector<16x32xf32>
    %236 = vector.broadcast %17 : vector<1x32xf32> to vector<16x32xf32>
    %237 = arith.mulf %236, %235 : vector<16x32xf32>
    %238 = vector.broadcast %18 : vector<1x32xf32> to vector<16x32xf32>
    %239 = arith.addf %237, %238 : vector<16x32xf32>
    %240 = tpu.concatenate %239, %171 in 0 : vector<16x32xf32>, vector<2x32xf32> -> vector<18x32xf32>
    %241 = arith.truncf %240 : vector<18x32xf32> to vector<18x32xbf16>
    %cst_53 = arith.constant dense<0.000000e+00> : vector<18x96xf32>
    %242 = tpu.matmul %241, %25, %cst_53 {dimension_numbers = #tpu.dot_dimension_numbers<[1], [0], [0], [1], [0, 0, 1, 1], [], []>} : vector<18x32xbf16>, vector<32x96xbf16>, vector<18x96xf32> -> vector<18x96xf32>
    %243 = vector.broadcast %27 : vector<1x96xf32> to vector<18x96xf32>
    %244 = arith.addf %242, %243 : vector<18x96xf32>
    %245 = vector.extract_strided_slice %244 {offsets = [16, 0], sizes = [2, 32], strides = [1, 1]} : vector<18x96xf32> to vector<2x32xf32>
    %246 = vector.extract_strided_slice %244 {offsets = [0, 32], sizes = [18, 32], strides = [1, 1]} : vector<18x96xf32> to vector<18x32xf32>
    %247 = vector.extract_strided_slice %244 {offsets = [0, 64], sizes = [18, 32], strides = [1, 1]} : vector<18x96xf32> to vector<18x32xf32>
    %248 = vector.extract_strided_slice %247 {offsets = [0, 0], sizes = [16, 32], strides = [1, 1]} : vector<18x32xf32> to vector<16x32xf32>
    %249 = vector.extract_strided_slice %247 {offsets = [16, 0], sizes = [2, 32], strides = [1, 1]} : vector<18x32xf32> to vector<2x32xf32>
    %250 = vector.shape_cast %245 : vector<2x32xf32> to vector<2x1x32xf32>
    %251 = vector.shape_cast %250 : vector<2x1x32xf32> to vector<2x1x32xf32>
    %252 = vector.broadcast %251 : vector<2x1x32xf32> to vector<2x8x32xf32>
    %253 = vector.shape_cast %252 : vector<2x8x32xf32> to vector<16x32xf32>
    %254 = tpu.concatenate %253, %245 in 0 : vector<16x32xf32>, vector<2x32xf32> -> vector<18x32xf32>
    %255 = arith.mulf %254, %246 : vector<18x32xf32>
    %256 = arith.truncf %255 : vector<18x32xf32> to vector<18x32xbf16>
    %cst_54 = arith.constant dense<0.000000e+00> : vector<18x32xf32>
    %257 = tpu.matmul %256, %9, %cst_54 {dimension_numbers = #tpu.dot_dimension_numbers<[1], [0], [0], [1], [0, 0, 1, 1], [], []>} : vector<18x32xbf16>, vector<32x32xbf16>, vector<18x32xf32> -> vector<18x32xf32>
    %cst_55 = arith.constant 0.353553385 : f32
    %258 = vector.broadcast %cst_55 : f32 to vector<18x32xf32>
    %259 = arith.mulf %257, %258 : vector<18x32xf32>
    %260 = vector.extract_strided_slice %259 {offsets = [0, 0], sizes = [16, 32], strides = [1, 1]} : vector<18x32xf32> to vector<16x32xf32>
    %261 = vector.extract_strided_slice %259 {offsets = [16, 0], sizes = [2, 32], strides = [1, 1]} : vector<18x32xf32> to vector<2x32xf32>
    %262 = vector.shape_cast %260 : vector<16x32xf32> to vector<2x8x32xf32>
    %cst_56 = arith.constant dense<0xFF800000> : vector<2x32xf32>
    %263 = vector.multi_reduction <maximumf>, %262, %cst_56 [1] : vector<2x8x32xf32> to vector<2x32xf32>
    %264 = arith.maximumf %261, %263 : vector<2x32xf32>
    %265 = arith.subf %261, %264 : vector<2x32xf32>
    %266 = math.exp %265 : vector<2x32xf32>
    %267 = vector.shape_cast %264 : vector<2x32xf32> to vector<2x1x32xf32>
    %268 = vector.shape_cast %267 : vector<2x1x32xf32> to vector<2x1x32xf32>
    %269 = vector.broadcast %268 : vector<2x1x32xf32> to vector<2x8x32xf32>
    %270 = vector.shape_cast %269 : vector<2x8x32xf32> to vector<16x32xf32>
    %271 = arith.subf %260, %270 : vector<16x32xf32>
    %272 = math.exp %271 : vector<16x32xf32>
    %273 = vector.shape_cast %272 : vector<16x32xf32> to vector<2x8x32xf32>
    %cst_57 = arith.constant dense<0.000000e+00> : vector<2x32xf32>
    %274 = vector.multi_reduction <add>, %273, %cst_57 [1] : vector<2x8x32xf32> to vector<2x32xf32>
    %275 = arith.addf %266, %274 : vector<2x32xf32>
    %276 = tpu.reciprocal %275 {approx = true} : vector<2x32xf32> -> vector<2x32xf32>
    %277 = arith.mulf %266, %249 : vector<2x32xf32>
    %278 = arith.mulf %272, %248 : vector<16x32xf32>
    %279 = vector.shape_cast %278 : vector<16x32xf32> to vector<2x8x32xf32>
    %cst_58 = arith.constant dense<0.000000e+00> : vector<2x32xf32>
    %280 = vector.multi_reduction <add>, %279, %cst_58 [1] : vector<2x8x32xf32> to vector<2x32xf32>
    %281 = arith.addf %277, %280 : vector<2x32xf32>
    %282 = arith.mulf %281, %276 : vector<2x32xf32>
    %283 = arith.truncf %282 : vector<2x32xf32> to vector<2x32xbf16>
    %cst_59 = arith.constant dense<0.000000e+00> : vector<2x32xf32>
    %284 = tpu.matmul %283, %26, %cst_59 {dimension_numbers = #tpu.dot_dimension_numbers<[1], [0], [0], [1], [0, 0, 1, 1], [], []>} : vector<2x32xbf16>, vector<32x32xbf16>, vector<2x32xf32> -> vector<2x32xf32>
    %285 = vector.broadcast %28 : vector<1x32xf32> to vector<2x32xf32>
    %286 = arith.addf %284, %285 : vector<2x32xf32>
    %cst_60 = arith.constant 0.000000e+00 : f32
    %287 = vector.broadcast %cst_60 : f32 to vector<2x32xf32>
    %288 = arith.maximumf %286, %287 : vector<2x32xf32>
    %cst_61 = arith.constant dense<0.000000e+00> : vector<2xf32>
    %289 = vector.multi_reduction <add>, %288, %cst_61 [1] : vector<2x32xf32> to vector<2xf32>
    %290 = vector.shape_cast %289 : vector<2xf32> to vector<2x1xf32>
    %cst_62 = arith.constant 3.200000e+01 : f32
    %291 = vector.broadcast %cst_62 : f32 to vector<2x1xf32>
    %292 = arith.divf %290, %291 : vector<2x1xf32>
    %293 = vector.broadcast %292 : vector<2x1xf32> to vector<2x32xf32>
    %294 = arith.subf %288, %293 : vector<2x32xf32>
    %295 = arith.mulf %294, %294 : vector<2x32xf32>
    %cst_63 = arith.constant dense<0.000000e+00> : vector<2xf32>
    %296 = vector.multi_reduction <add>, %295, %cst_63 [1] : vector<2x32xf32> to vector<2xf32>
    %297 = vector.shape_cast %296 : vector<2xf32> to vector<2x1xf32>
    %cst_64 = arith.constant 3.200000e+01 : f32
    %298 = vector.broadcast %cst_64 : f32 to vector<2x1xf32>
    %299 = arith.divf %297, %298 : vector<2x1xf32>
    %300 = vector.broadcast %292 : vector<2x1xf32> to vector<2x32xf32>
    %301 = arith.subf %288, %300 : vector<2x32xf32>
    %cst_65 = arith.constant 9.99999996E-13 : f32
    %302 = vector.broadcast %cst_65 : f32 to vector<2x1xf32>
    %303 = arith.addf %299, %302 : vector<2x1xf32>
    %304 = math.rsqrt %303 : vector<2x1xf32>
    %305 = vector.broadcast %304 : vector<2x1xf32> to vector<2x32xf32>
    %306 = arith.mulf %301, %305 : vector<2x32xf32>
    %307 = vector.broadcast %19 : vector<1x32xf32> to vector<2x32xf32>
    %308 = arith.mulf %307, %306 : vector<2x32xf32>
    %309 = vector.broadcast %20 : vector<1x32xf32> to vector<2x32xf32>
    %310 = arith.addf %308, %309 : vector<2x32xf32>
    %311 = vector.shape_cast %239 : vector<16x32xf32> to vector<2x8x32xf32>
    %cst_66 = arith.constant dense<0.000000e+00> : vector<2x32xf32>
    %312 = vector.multi_reduction <add>, %311, %cst_66 [1] : vector<2x8x32xf32> to vector<2x32xf32>
    %cst_67 = arith.constant 1.250000e-01 : f32
    %313 = vector.broadcast %cst_67 : f32 to vector<2x32xf32>
    %314 = arith.mulf %312, %313 : vector<2x32xf32>
    %315 = arith.addf %314, %310 : vector<2x32xf32>
    %316 = arith.truncf %315 : vector<2x32xf32> to vector<2x32xbf16>
    %cst_68 = arith.constant dense<0.000000e+00> : vector<2x128xf32>
    %317 = tpu.matmul %316, %6, %cst_68 {dimension_numbers = #tpu.dot_dimension_numbers<[1], [0], [0], [1], [0, 0, 1, 1], [], []>} : vector<2x32xbf16>, vector<32x128xbf16>, vector<2x128xf32> -> vector<2x128xf32>
    %318 = vector.broadcast %16 : vector<1x128xf32> to vector<2x128xf32>
    %319 = arith.addf %317, %318 : vector<2x128xf32>
    %cst_69 = arith.constant 0.000000e+00 : f32
    %320 = vector.broadcast %cst_69 : f32 to vector<8x128xf32>
    %c0_70 = arith.constant 0 : index
    %c0_71 = arith.constant 0 : index
    %321 = vector.load %arg2[%c0_70, %c0_71] : memref<8x128xf32, #tpu.memory_space<vmem>>, vector<8x128xf32>
    tpu.vector_store %arg2[%c0_70, %c0_71], %320 {strides = array<i32>} : memref<8x128xf32, #tpu.memory_space<vmem>>, vector<8x128xf32>,
    %c0_72 = arith.constant 0 : index
    %c0_73 = arith.constant 0 : index
    %322 = vector.load %arg2[%c0_72, %c0_73] : memref<8x128xf32, #tpu.memory_space<vmem>>, vector<2x128xf32>
    tpu.vector_store %arg2[%c0_72, %c0_73], %319 {strides = array<i32>} : memref<8x128xf32, #tpu.memory_space<vmem>>, vector<2x128xf32>,
    return
  }
}

</mosaic_0001>

<bundles_post_ra>
// kernel: tpu_custom_call.1
= control target key start
LH: loop header
LB: loop body
LE: loop exit
PB: predicated region body
PF: predicated region fallthrough
CT: control target
= control target key end

     0   :  { %7 = vsyncpa [#allocation3], 0  ;;  %s2939_s0 = inlined_call_operand.hbm [shape: f32[16,32], index: 0, kind: input, shape index: {}]   ;;  %s2940_s1 = inlined_call_operand.hbm [shape: f32[176,128], index: 1, kind: input, shape index: {}]   ;;  %s2941_s2 = inlined_call_operand.hbm [shape: f32[8,128], index: 2, kind: output, shape index: {}]  }
   0x1   :  { %8 = vsyncpa [#allocation6], 0 }
   0x2   :  { %9 = vsyncpa [#allocation4], 0  ;;  %s2379_s9 = smov [#allocation2]   ;;  %s2307_s13 = scalar_lea.hbm %s2939_s0, 256 }
   0x3   :  { %s15_s10 = sshll.u32 %s2379_s9, 4  ;;  %p2308_p0 = scmp.ne.s32.totalorder %s2939_s0, %s2307_s13  ;;  %s16_s10 = int_to_ptr.vmem [resolvable:$true] %s15_s10 }
   0x4   :  { %p2311_p1 = scmp.lt.u32.totalorder %s2307_s13, %s2939_s0 }
   0x6   :  { %p2313_p2 = pnand %p2311_p1, %p2308_p0 }
   0x8   :  { %2316 = shalt.err (!%p2313_p2)
}
   0x9   :  { %s2317_s18 = scalar_lea.vmem %s16_s10, 256  ;;  %p2322_p4 = scmp.lt.s32.totalorder %s16_s10, %s16_s10 }
   0xa   :  { %p2318_p3 = scmp.ne.s32.totalorder %s16_s10, %s2317_s18  ;;  %p2323_p5 = scmp.lt.s32.totalorder %s2317_s18, %s2317_s18 }
   0xc   :  { %p2324_p6 = por %p2323_p5, %p2322_p4 }
   0xe   :  { %p2325_p7 = pnand %p2324_p6, %p2318_p3 }
  0x10   :  { %2328 = shalt.err (!%p2325_p7)
}
  0x11   :  { %s2380_s19 = smov 128   ;;  %s2381_s20 = smov 8  }
  0x12   :  { %21 = dma.hbm_to_vmem [thread:$0]  %s2939_s0, 256, %s16_s10, [#allocation3], %s2380_s19, %s2380_s19, %s2381_s20  }
  0x13   :  { %s2382_s23 = smov [#allocation5]   ;;  %s2329_s27 = scalar_lea.hbm %s2940_s1, 2816 }
  0x14   :  { %s27_s24 = sshll.u32 %s2382_s23, 4  ;;  %p2330_p8 = scmp.ne.s32.totalorder %s2940_s1, %s2329_s27  ;;  %s28_s24 = int_to_ptr.vmem [resolvable:$true] %s27_s24 }
  0x15   :  { %p2333_p9 = scmp.lt.u32.totalorder %s2329_s27, %s2940_s1 }
  0x17   :  { %p2335_p10 = pnand %p2333_p9, %p2330_p8 }
  0x19   :  { %2338 = shalt.err (!%p2335_p10)
}
  0x1a   :  { %s2339_s4 = scalar_lea.vmem %s28_s24, 2816  ;;  %p2344_p12 = scmp.lt.s32.totalorder %s28_s24, %s28_s24 }
  0x1b   :  { %p2340_p11 = scmp.ne.s32.totalorder %s28_s24, %s2339_s4  ;;  %p2345_p13 = scmp.lt.s32.totalorder %s2339_s4, %s2339_s4 }
  0x1d   :  { %p2346_p0 = por %p2345_p13, %p2344_p12 }
  0x1f   :  { %p2347_p1 = pnand %p2346_p0, %p2340_p11 }
  0x21   :  { %2350 = shalt.err (!%p2347_p1)
}
  0x22   :  { %33 = dma.hbm_to_vmem [thread:$0]  %s2940_s1, 2816, %s28_s24, [#allocation6], %s2380_s19, %s2380_s19, %s2381_s20  }
  0x23   :  { %2373 = dma.done.wait [#allocation3], 256  }
  0x24   :  { %2374 = vsyncadd [#allocation3], 4294967040 }
  0x25   :  { %2375 = dma.done.wait [#allocation6], 2816  }
  0x26   :  { %2376 = vsyncadd [#allocation6], 4294964480  ;;  %v2383_v0 = vmov 0.0   ;;  %vm2384_vm0 = vmmov 0   ;;  %v41_v1 = vld [vmem:[#allocation2] sm:$0xff]  ;;  %v42_v2 = vld [vmem:[#allocation2 + $0x8] sm:$0xff]  ;;  %v137_v32 = vlaneseq }
  0x27   :  { %2032 = vmatprep.subr.bf16.mxu0 %v2383_v0  ;;  %1912 = vst [vmem:[#allocation7] sm:$0xff] %v2383_v0  ;;  %2034 = vmatprep.mubr.msk.bf16.mxu0 %vm2384_vm0, %v2383_v0  ;;  %v67_v3 = vld [vmem:[#allocation5 + $0x80] sm:$0xff]  ;;  %v2436_v4 = vpack.c.bf16 %v42_v2, %v41_v1  ;;  %v68_v5 = vld [vmem:[#allocation5 + $0x88] sm:$0xff]  ;;  %vm92_vm1 = vcmask 130048   ;;  %v45_v10 = vld [vmem:[#allocation5 + $0x10] sm:$0xff]  ;;  %vm74_vm2 = vcmask 261120  }
  0x28   :  { %2038 = vmatprep.subr.bf16.mxu1 %v2383_v0  ;;  %2042 = vmatprep.mubr.msk.bf16.mxu1 %vm2384_vm0, %v2383_v0  ;;  %v43_v6 = vld [vmem:[#allocation5] sm:$0xff]  ;;  %v44_v7 = vld [vmem:[#allocation5 + $0x8] sm:$0xff]  ;;  %v2438_v8 = vpack.c.bf16 %v68_v5, %v67_v3  ;;  %v46_v11 = vld [vmem:[#allocation5 + $0x18] sm:$0xff]  ;;  %v75_v13 = vsel %vm74_vm2, %v41_v1, 0.0  ;;  %v82_v14 = vsel %vm74_vm2, %v42_v2, 0.0  ;;  %vm609_vm3 = vcmask 1041409  }
  0x29   :  { %v2440_v9 = vpack.c.bf16 %v44_v7, %v43_v6  ;;  %2033 = vmatpush3.bf16.msra.mxu0 %v2436_v4  ;;  %v2450_v12 = vpack.c.bf16 %v46_v11, %v45_v10  ;;  %v76_v15 = vrot.slane %v75_v13, 4  ;;  %v83_v16 = vrot.slane %v82_v14, 4  ;;  %v2483_v46 = vld [vmem:[#allocation5 + $0x90] ss:$0 sm:$0xff]  ;;  %s2385_s1 = smov 32   ;;  %v64_v7 = vld [vmem:[#allocation5 + $0x78] sm:$0xff] }
  0x2a   :  { %2062 = vmatprep.subr.bf16.mxu0 %v2383_v0  ;;  %v2460_v36 = vshrl.u32 %v137_v32, 7  ;;  %v63_v3 = vld [vmem:[#allocation5 + $0x70] sm:$0xff]  ;;  %s2386_s6 = smov 96   ;;  %s2387_s7 = smov 64   ;;  %vm948_vm4 = vcmask 254976  }
  0x2b   :  { %2039 = vmatpush3.bf16.msra.mxu1 %v2440_v9  ;;  %v77_v17 = vadd.f32 %v76_v15, %v75_v13  ;;  %v84_v18 = vadd.f32 %v83_v16, %v82_v14  ;;  %v2495_v10 = vpack.c.bf16 %v64_v7, %v63_v3  ;;  %s2389_s8 = smov [#allocation7]  }
  0x2c   :  { %2040 = vmatprep.subr.bf16.mxu1 %v2383_v0  ;;  %2035 = vmatmul.mubr.msk.bf16.vlgmr.msra.gmra.mrb[0].mxu0 %vm92_vm1, %v2438_v8  ;;  %v2465_v37 = vsub.s32 0, %v2460_v36  ;;  %s1920_s9 = sshll.u32 %s2389_s8, 4  ;;  %s1921_s9 = int_to_ptr.vmem [resolvable:$true] %s1920_s9 }
  0x2d   :  { %2066 = vmatprep.mubr.msk.bf16.mxu0 %vm2384_vm0, %v2383_v0  ;;  %v78_v19 = vrot.slane %v77_v17, 2  ;;  %v85_v20 = vrot.slane %v84_v18, 2  ;;  %s2351_s10 = scalar_lea.vmem %s1921_s9, 128  ;;  %p2356_p3 = scmp.lt.s32.totalorder %s1921_s9, %s1921_s9 }
  0x2e   :  { %v140_v38 = vrot.slane %v41_v1, %v2465_v37  ;;  %v144_v39 = vrot.slane %v42_v2, %v2465_v37  ;;  %v61_v1 = vld [vmem:[#allocation5 + $0x60] sm:$0xff]  ;;  %v62_v2 = vld [vmem:[#allocation5 + $0x68] sm:$0xff]  ;;  %p2352_p2 = scmp.ne.s32.totalorder %s1921_s9, %s2351_s10  ;;  %p2357_p4 = scmp.lt.s32.totalorder %s2351_s10, %s2351_s10 }
  0x2f   :  { %2041 = vmatpush3.bf16.msra.mxu1 %v2450_v12  ;;  %v79_v21 = vadd.f32 %v78_v19, %v77_v17  ;;  %v86_v22 = vadd.f32 %v85_v20, %v84_v18  ;;  %v2492_v6 = vpack.c.bf16 %v62_v2, %v61_v1 }
  0x30   :  { %2086 = vmatprep.subr.bf16.mxu1 %v2383_v0  ;;  %v146_v40 = vpack.c.bf16 %v144_v39, %v140_v38  ;;  %p2358_p5 = por %p2357_p4, %p2356_p3 }
  0x31   :  { %v80_v23 = vrot.slane %v79_v21, 1  ;;  %v87_v24 = vrot.slane %v86_v22, 1  ;;  %2063 = vmatpush3.bf16.msra.mxu0 %v2492_v6 }
  0x32   :  { %2064 = vmatprep.subr.bf16.mxu0 %v2383_v0  ;;  %p2359_p6 = pnand %p2358_p5, %p2352_p2 }
  0x33   :  { %v81_v25 = vadd.f32 %v80_v23, %v79_v21  ;;  %v88_v26 = vadd.f32 %v87_v24, %v86_v22 }
  0x35   :  { %v89_v27 = vmul.f32 0.125, %v81_v25  ;;  %v90_v28 = vmul.f32 0.125, %v88_v26  ;;  %2065 = vmatpush3.bf16.msra.mxu0 %v2495_v10 }
  0x37   :  { %v2457_v29 = vsel %vm609_vm3, %v90_v28, %v89_v27  ;;  %v147_v41 = vpack.c.bf16 %v90_v28, %v89_v27 }
  0xff   :  { %v130_v30 = vpop.f32.mrb[0].mxu0 }
 0x100   :  { %v2036_v31 = vpop.f32.mrb[1].mxu0 }
 0x101   :  { %v133_v33 = vpop.f32.mrb[2].mxu0 }
 0x102   :  { %v145_v34 = vpack.c.bf16 %v133_v33, %v130_v30  ;;  %v2037_v35 = vpop.f32.mrb[3].mxu0 }
 0x104   :  { %2043 = vmatmul.mubr.msk.bf16.vlgmr.msra.gmra.mrb[0].mxu1 %vm74_vm2, %v145_v34 }
 0x105   :  { %2046 = vmatprep.mubr.msk.bf16.mxu1 %vm2384_vm0, %v2383_v0 }
 0x10c   :  { %2047 = vmatmul.mubr.msk.bf16.gmra.mrb[4].mxu1 %vm74_vm2, %v2436_v4 }
 0x10d   :  { %2050 = vmatprep.mubr.msk.bf16.mxu1 %vm2384_vm0, %v2383_v0 }
 0x114   :  { %2051 = vmatmul.mubr.msk.bf16.gmra.mrb[8].mxu1 %vm74_vm2, %v146_v40 }
 0x115   :  { %2054 = vmatprep.mubr.msk.bf16.mxu1 %vm2384_vm0, %v2383_v0 }
 0x11c   :  { %2055 = vmatmul.mubr.msk.bf16.gmra.mrb[12].mxu1 %vm74_vm2, %v2436_v4 }
 0x11d   :  { %2058 = vmatprep.mubr.msk.bf16.mxu1 %vm2384_vm0, %v2383_v0 }
 0x124   :  { %2059 = vmatmul.mubr.msk.bf16.gmra.mrb[16].mxu1 %vm74_vm2, %v147_v41 }
 0x125   :  { %2090 = vmatprep.mubr.msk.bf16.mxu1 %vm2384_vm0, %v2383_v0 }
 0x1d7   :  { %v198_v42 = vpop.f32.mrb[0].mxu1 }
 0x1d8   :  { %v2044_v43 = vpop.f32.mrb[1].mxu1  ;;  %v199_v17 = vadd.f32 %v2483_v46, %v198_v42 }
 0x1d9   :  { %v201_v44 = vpop.f32.mrb[2].mxu1 }
 0x1da   :  { %v2045_v45 = vpop.f32.mrb[3].mxu1  ;;  %v202_v20 = vadd.f32 %v2483_v46, %v201_v44 }
 0x1df   :  { %v206_v47 = vpop.f32.mrb[4].mxu1 }
 0x1e0   :  { %v2486_v48 = vadd.f32 %v2483_v46, %v206_v47  ;;  %v2048_v49 = vpop.f32.mrb[5].mxu1 }
 0x1e1   :  { %v209_v50 = vpop.f32.mrb[6].mxu1 }
 0x1e2   :  { %239 = vrot.lane.b32.xlu0 %v2486_v48, %s2385_s1  ;;  %v2049_v51 = vpop.f32.mrb[7].mxu1  ;;  %v210_v52 = vadd.f32 %v2483_v46, %v209_v50 }
 0x1e6   :  { %241 = vrot.lane.b32.xlu0 %v210_v52, %s2385_s1 }
 0x1e7   :  { %v214_v53 = vpop.f32.mrb[8].mxu1 }
 0x1e8   :  { %v2052_v54 = vpop.f32.mrb[9].mxu1  ;;  %v215_v11 = vadd.f32 %v2483_v46, %v214_v53 }
 0x1e9   :  { %v217_v55 = vpop.f32.mrb[10].mxu1 }
 0x1ea   :  { %v2053_v56 = vpop.f32.mrb[11].mxu1  ;;  %v218_v14 = vadd.f32 %v2483_v46, %v217_v55 }
 0x1ef   :  { %v222_v57 = vpop.f32.mrb[12].mxu1 }
 0x1f0   :  { %v2056_v58 = vpop.f32.mrb[13].mxu1  ;;  %v223_v18 = vadd.f32 %v2483_v46, %v222_v57 }
 0x1f1   :  { %v225_v59 = vpop.f32.mrb[14].mxu1 }
 0x1f2   :  { %v2057_v60 = vpop.f32.mrb[15].mxu1  ;;  %v226_v19 = vadd.f32 %v2483_v46, %v225_v59 }
 0x1f7   :  { %v230_v61 = vpop.f32.mrb[16].mxu1 }
 0x1f8   :  { %v2060_v62 = vpop.f32.mrb[17].mxu1  ;;  %v231_v15 = vadd.f32 %v2483_v46, %v230_v61 }
 0x1f9   :  { %v233_v63 = vpop.f32.mrb[18].mxu1 }
 0x1fa   :  { %v2061_v5 = vpop.f32.mrb[19].mxu1  ;;  %v234_v16 = vadd.f32 %v2483_v46, %v233_v63 }
 0x254   :  { %v240_v13 = vpop.permute.xlu0 %239 }
 0x255   :  { %v245_v22 = vmul.f32 %v240_v13, %v199_v17  ;;  %v249_v23 = vmul.f32 %v240_v13, %v215_v11  ;;  %v253_v26 = vmul.f32 %v240_v13, %v231_v15  ;;  %v251_v28 = vmul.f32 %v240_v13, %v223_v18 }
 0x256   :  { %v247_v38 = vmul.f32 %v240_v13, %v2486_v48 }
 0x258   :  { %v242_v21 = vpop.permute.xlu0 %241 }
 0x259   :  { %v246_v24 = vmul.f32 %v242_v21, %v202_v20  ;;  %v250_v25 = vmul.f32 %v242_v21, %v218_v14  ;;  %v254_v27 = vmul.f32 %v242_v21, %v234_v16  ;;  %v252_v30 = vmul.f32 %v242_v21, %v226_v19 }
 0x25a   :  { %v248_v33 = vmul.f32 %v242_v21, %v210_v52 }
 0x25b   :  { %v255_v31 = vpack.c.bf16 %v246_v24, %v245_v22  ;;  %v257_v32 = vpack.c.bf16 %v250_v25, %v249_v23  ;;  %v259_v34 = vpack.c.bf16 %v254_v27, %v253_v26  ;;  %v258_v35 = vpack.c.bf16 %v252_v30, %v251_v28 }
 0x25c   :  { %v256_v39 = vpack.c.bf16 %v248_v33, %v247_v38 }
 0x25d   :  { %265 = vrot.lane.b32.xlu1 %v255_v31, %s2386_s6  ;;  %269 = vrot.lane.b32.xlu0 %v257_v32, %s2386_s6 }
 0x261   :  { %267 = vrot.lane.b32.xlu1 %v256_v39, %s2386_s6  ;;  %273 = vrot.lane.b32.xlu0 %v259_v34, %s2386_s6 }
 0x265   :  { %271 = vrot.lane.b32.xlu1 %v258_v35, %s2386_s6  ;;  %451 = vrot.lane.b32.xlu0 %v202_v20, %s2387_s7 }
 0x269   :  { %449 = vrot.lane.b32.xlu1 %v199_v17, %s2387_s7  ;;  %455 = vrot.lane.b32.xlu0 %v210_v52, %s2387_s7 }
 0x26d   :  { %453 = vrot.lane.b32.xlu1 %v2486_v48, %s2387_s7  ;;  %459 = vrot.lane.b32.xlu0 %v218_v14, %s2387_s7 }
 0x271   :  { %457 = vrot.lane.b32.xlu1 %v215_v11, %s2387_s7  ;;  %463 = vrot.lane.b32.xlu0 %v226_v19, %s2387_s7 }
 0x275   :  { %461 = vrot.lane.b32.xlu1 %v223_v18, %s2387_s7  ;;  %467 = vrot.lane.b32.xlu0 %v234_v16, %s2387_s7 }
 0x279   :  { %465 = vrot.lane.b32.xlu1 %v231_v15, %s2387_s7  ;;  %514 = vrot.lane.b32.xlu0 %v2450_v12, %s2385_s1 }
 0x27d   :  { %512 = vrot.lane.b32.xlu1 %v2440_v9, %s2385_s1 }
 0x281   :  { %519 = vrot.lane.b32.xlu1 %v2483_v46, %s2385_s1 }
 0x2cf   :  { %v266_v40 = vpop.permute.xlu1 %265  ;;  %v270_v42 = vpop.permute.xlu0 %269 }
 0x2d0   :  { %2067 = vmatmul.mubr.msk.bf16.vlgmr.msra.gmra.mrb[4].mxu0 %vm74_vm2, %v266_v40 }
 0x2d1   :  { %2070 = vmatprep.mubr.msk.bf16.mxu0 %vm2384_vm0, %v2383_v0 }
 0x2d3   :  { %v268_v41 = vpop.permute.xlu1 %267  ;;  %v274_v44 = vpop.permute.xlu0 %273 }
 0x2d7   :  { %v272_v43 = vpop.permute.xlu1 %271  ;;  %v2545_v47 = vpop.permute.xlu0 %451 }
 0x2d8   :  { %2071 = vmatmul.mubr.msk.bf16.gmra.mrb[8].mxu0 %vm74_vm2, %v268_v41 }
 0x2d9   :  { %2074 = vmatprep.mubr.msk.bf16.mxu0 %vm2384_vm0, %v2383_v0 }
 0x2db   :  { %v2543_v45 = vpop.permute.xlu1 %449  ;;  %v2549_v49 = vpop.permute.xlu0 %455 }
 0x2df   :  { %v2547_v48 = vpop.permute.xlu1 %453  ;;  %v2553_v51 = vpop.permute.xlu0 %459 }
 0x2e0   :  { %2075 = vmatmul.mubr.msk.bf16.gmra.mrb[12].mxu0 %vm74_vm2, %v270_v42 }
 0x2e1   :  { %2078 = vmatprep.mubr.msk.bf16.mxu0 %vm2384_vm0, %v2383_v0 }
 0x2e3   :  { %v2551_v50 = vpop.permute.xlu1 %457  ;;  %v2557_v53 = vpop.permute.xlu0 %463 }
 0x2e7   :  { %v2555_v52 = vpop.permute.xlu1 %461  ;;  %v2561_v55 = vpop.permute.xlu0 %467 }
 0x2e8   :  { %2079 = vmatmul.mubr.msk.bf16.gmra.mrb[16].mxu0 %vm74_vm2, %v272_v43 }
 0x2e9   :  { %2082 = vmatprep.mubr.msk.bf16.mxu0 %vm2384_vm0, %v2383_v0 }
 0x2eb   :  { %v2559_v54 = vpop.permute.xlu1 %465  ;;  %v2567_v57 = vpop.permute.xlu0 %514 }
 0x2ef   :  { %v2563_v56 = vpop.permute.xlu1 %512 }
 0x2f0   :  { %2083 = vmatmul.mubr.msk.bf16.gmra.mrb[20].mxu0 %vm74_vm2, %v274_v44  ;;  %2087 = vmatpush3.bf16.msra.mxu1 %v2563_v56 }
 0x2f1   :  { %2088 = vmatprep.subr.bf16.mxu1 %v2383_v0 }
 0x2f4   :  { %2089 = vmatpush3.bf16.msra.mxu1 %v2567_v57 }
 0x2f5   :  { %2102 = vmatprep.subr.bf16.mxu1 %v2492_v6 }
 0x3a3   :  { %v324_v58 = vpop.f32.mrb[4].mxu0 }
 0x3a4   :  { %v2068_v59 = vpop.f32.mrb[5].mxu0  ;;  %v363_v3 = vmul.f32 0.35355338, %v324_v58 }
 0x3a5   :  { %v327_v60 = vpop.f32.mrb[6].mxu0 }
 0x3a6   :  { %v2069_v61 = vpop.f32.mrb[7].mxu0  ;;  %v364_v7 = vmul.f32 0.35355338, %v327_v60  ;;  %v373_v15 = vsel %vm74_vm2, %v363_v3, -inf }
 0x3a8   :  { %v382_v20 = vsel %vm74_vm2, %v364_v7, -inf }
 0x3ab   :  { %v332_v62 = vpop.f32.mrb[8].mxu0 }
 0x3ac   :  { %v2072_v63 = vpop.f32.mrb[9].mxu0  ;;  %v365_v23 = vmul.f32 0.35355338, %v332_v62 }
 0x3ad   :  { %v335_v1 = vpop.f32.mrb[10].mxu0 }
 0x3ae   :  { %v2073_v2 = vpop.f32.mrb[11].mxu0  ;;  %v366_v25 = vmul.f32 0.35355338, %v335_v1  ;;  %v374_v30 = vsel %vm74_vm2, %v365_v23, -inf }
 0x3b0   :  { %v383_v35 = vsel %vm74_vm2, %v366_v25, -inf }
 0x3b3   :  { %v340_v5 = vpop.f32.mrb[12].mxu0 }
 0x3b4   :  { %v367_v11 = vmul.f32 0.35355338, %v340_v5  ;;  %v2076_v13 = vpop.f32.mrb[13].mxu0 }
 0x3b5   :  { %v343_v14 = vpop.f32.mrb[14].mxu0 }
 0x3b6   :  { %v375_v16 = vsel %vm74_vm2, %v367_v11, -inf  ;;  %v368_v17 = vmul.f32 0.35355338, %v343_v14  ;;  %v2077_v18 = vpop.f32.mrb[15].mxu0 }
 0x3b7   :  { %v376_v19 = vmax.f32 %v373_v15, %v375_v16 }
 0x3b8   :  { %v384_v21 = vsel %vm74_vm2, %v368_v17, -inf }
 0x3b9   :  { %v385_v22 = vmax.f32 %v382_v20, %v384_v21 }
 0x3bb   :  { %v348_v24 = vpop.f32.mrb[16].mxu0 }
 0x3bc   :  { %v369_v26 = vmul.f32 0.35355338, %v348_v24  ;;  %v2080_v27 = vpop.f32.mrb[17].mxu0 }
 0x3bd   :  { %v351_v28 = vpop.f32.mrb[18].mxu0 }
 0x3be   :  { %v377_v31 = vsel %vm74_vm2, %v369_v26, -inf  ;;  %v370_v32 = vmul.f32 0.35355338, %v351_v28  ;;  %v2081_v33 = vpop.f32.mrb[19].mxu0 }
 0x3bf   :  { %v378_v34 = vmax.f32 %v374_v30, %v377_v31 }
 0x3c0   :  { %v386_v38 = vsel %vm74_vm2, %v370_v32, -inf }
 0x3c1   :  { %v387_v39 = vmax.f32 %v383_v35, %v386_v38 }
 0x3c3   :  { %v356_v40 = vpop.f32.mrb[20].mxu0 }
 0x3c4   :  { %v371_v41 = vmul.f32 0.35355338, %v356_v40  ;;  %v2084_v42 = vpop.f32.mrb[21].mxu0 }
 0x3c5   :  { %v359_v43 = vpop.f32.mrb[22].mxu0 }
 0x3c6   :  { %v379_v44 = vsel %vm74_vm2, %v371_v41, -inf  ;;  %v372_v58 = vmul.f32 0.35355338, %v359_v43  ;;  %v2085_v59 = vpop.f32.mrb[23].mxu0 }
 0x3c7   :  { %v380_v60 = vmax.f32 %v376_v19, %v379_v44 }
 0x3c8   :  { %v388_v61 = vsel %vm74_vm2, %v372_v58, -inf }
 0x3c9   :  { %v381_v62 = vmax.f32 %v380_v60, %v378_v34  ;;  %v389_v63 = vmax.f32 %v385_v22, %v388_v61 }
 0x3cb   :  { %v391_v1 = vsub.f32 %v363_v3, %v381_v62  ;;  %v393_v2 = vsub.f32 %v365_v23, %v381_v62  ;;  %v395_v5 = vsub.f32 %v367_v11, %v381_v62  ;;  %v397_v13 = vsub.f32 %v369_v26, %v381_v62 }
 0x3cc   :  { %v399_v14 = vsub.f32 %v371_v41, %v381_v62  ;;  %v390_v15 = vmax.f32 %v389_v63, %v387_v39 }
 0x3cd   :  { %v401_v16 = vmul.f32 1.442695, %v391_v1  ;;  %v405_v18 = vmul.f32 1.442695, %v393_v2  ;;  %v409_v20 = vmul.f32 1.442695, %v395_v5 }
 0x3ce   :  { %v413_v21 = vmul.f32 1.442695, %v397_v13  ;;  %v417_v24 = vmul.f32 1.442695, %v399_v14  ;;  %v392_v27 = vsub.f32 %v364_v7, %v390_v15  ;;  %v394_v28 = vsub.f32 %v366_v25, %v390_v15 }
 0x3cf   :  { %2228 = vpow2.f32 %v401_v16  ;;  %v396_v30 = vsub.f32 %v368_v17, %v390_v15  ;;  %v398_v19 = vsub.f32 %v370_v32, %v390_v15  ;;  %v400_v31 = vsub.f32 %v372_v58, %v390_v15 }
 0x3d0   :  { %2230 = vpow2.f32 %v405_v18  ;;  %v403_v33 = vmul.f32 1.442695, %v392_v27  ;;  %v407_v3 = vmul.f32 1.442695, %v394_v28 }
 0x3d1   :  { %2232 = vpow2.f32 %v409_v20  ;;  %v411_v11 = vmul.f32 1.442695, %v396_v30  ;;  %v415_v22 = vmul.f32 1.442695, %v398_v19  ;;  %v419_v23 = vmul.f32 1.442695, %v400_v31 }
 0x3d2   :  { %2234 = vpow2.f32 %v413_v21 }
 0x3d3   :  { %2236 = vpow2.f32 %v417_v24 }
 0x3d4   :  { %2238 = vpow2.f32 %v403_v33 }
 0x3d5   :  { %2240 = vpow2.f32 %v407_v3 }
 0x3d6   :  { %2242 = vpow2.f32 %v411_v11 }
 0x3d7   :  { %2244 = vpow2.f32 %v415_v22 }
 0x3d8   :  { %2246 = vpow2.f32 %v419_v23 }
 0x3d9   :  { %v2229_v26 = vpop.eup %2228 }
 0x3da   :  { %v2231_v7 = vpop.eup %2230  ;;  %v421_v17 = vsel %vm74_vm2, %v2229_v26, 0.0  ;;  %v479_v25 = vmul.f32 %v2229_v26, %v2543_v45 }
 0x3db   :  { %v2233_v32 = vpop.eup %2232  ;;  %v422_v34 = vsel %vm74_vm2, %v2231_v7, 0.0  ;;  %v481_v35 = vmul.f32 %v2231_v7, %v2547_v48 }
 0x3dc   :  { %v2235_v38 = vpop.eup %2234  ;;  %v423_v39 = vadd.f32 %v422_v34, %v421_v17  ;;  %v483_v40 = vmul.f32 %v2233_v32, %v2551_v50  ;;  %v489_v41 = vsel %vm74_vm2, %v479_v25, 0.0  ;;  %v424_v43 = vsel %vm74_vm2, %v2233_v32, 0.0 }
 0x3dd   :  { %v2237_v42 = vpop.eup %2236  ;;  %v485_v44 = vmul.f32 %v2235_v38, %v2555_v52  ;;  %v490_v58 = vsel %vm74_vm2, %v481_v35, 0.0  ;;  %v426_v60 = vsel %vm74_vm2, %v2235_v38, 0.0 }
 0x3de   :  { %v2239_v59 = vpop.eup %2238  ;;  %v425_v45 = vadd.f32 %v424_v43, %v423_v39  ;;  %v491_v61 = vadd.f32 %v490_v58, %v489_v41  ;;  %v487_v48 = vmul.f32 %v2237_v42, %v2559_v54  ;;  %v492_v63 = vsel %vm74_vm2, %v483_v40, 0.0 }
 0x3df   :  { %v2241_v62 = vpop.eup %2240  ;;  %v430_v50 = vsel %vm74_vm2, %v2239_v59, 0.0  ;;  %v480_v1 = vmul.f32 %v2239_v59, %v2545_v47  ;;  %v428_v15 = vsel %vm74_vm2, %v2237_v42, 0.0  ;;  %v494_v16 = vsel %vm74_vm2, %v485_v44, 0.0 }
 0x3e0   :  { %v2243_v2 = vpop.eup %2242  ;;  %v427_v5 = vadd.f32 %v426_v60, %v425_v45  ;;  %v493_v13 = vadd.f32 %v492_v63, %v491_v61  ;;  %v431_v52 = vsel %vm74_vm2, %v2241_v62, 0.0  ;;  %v482_v20 = vmul.f32 %v2241_v62, %v2549_v49  ;;  %v2622_v63 = vld [vmem:[#allocation5 + $0xa0] ss:$0 sm:$0xff] }
 0x3e1   :  { %v2245_v14 = vpop.eup %2244  ;;  %v432_v18 = vadd.f32 %v431_v52, %v430_v50  ;;  %v433_v24 = vsel %vm74_vm2, %v2243_v2, 0.0  ;;  %v484_v27 = vmul.f32 %v2243_v2, %v2553_v51  ;;  %v496_v28 = vsel %vm74_vm2, %v487_v48, 0.0  ;;  %v49_v50 = vld [vmem:[#allocation5 + $0x20] sm:$0xff] }
 0x3e2   :  { %v429_v54 = vadd.f32 %v428_v15, %v427_v5  ;;  %v495_v21 = vadd.f32 %v494_v16, %v493_v13  ;;  %v2247_v47 = vpop.eup %2246  ;;  %v435_v19 = vsel %vm74_vm2, %v2245_v14, 0.0  ;;  %v498_v31 = vsel %vm74_vm2, %v480_v1, 0.0  ;;  %v50_v1 = vld [vmem:[#allocation5 + $0x28] sm:$0xff] }
 0x3e3   :  { %v434_v30 = vadd.f32 %v433_v24, %v432_v18  ;;  %v486_v3 = vmul.f32 %v2245_v14, %v2557_v53  ;;  %v499_v49 = vsel %vm74_vm2, %v482_v20, 0.0  ;;  %v437_v23 = vsel %vm74_vm2, %v2247_v47, 0.0  ;;  %v51_v24 = vld [vmem:[#allocation5 + $0x30] sm:$0xff] }
 0x3e4   :  { %2248 = vrcp.f32 %v429_v54  ;;  %v497_v33 = vadd.f32 %v496_v28, %v495_v21  ;;  %v500_v22 = vadd.f32 %v499_v49, %v498_v31  ;;  %v488_v51 = vmul.f32 %v2247_v47, %v2561_v55  ;;  %v2616_v55 = vpop.permute.xlu1 %519 }
 0x3e5   :  { %v436_v11 = vadd.f32 %v435_v19, %v434_v30  ;;  %v501_v26 = vsel %vm74_vm2, %v484_v27, 0.0  ;;  %v503_v25 = vsel %vm74_vm2, %v486_v3, 0.0  ;;  %v2626_v2 = vpack.c.bf16 %v50_v1, %v49_v50  ;;  %v52_v27 = vld [vmem:[#allocation5 + $0x38] sm:$0xff] }
 0x3e6   :  { %v502_v17 = vadd.f32 %v501_v26, %v500_v22  ;;  %v505_v34 = vsel %vm74_vm2, %v488_v51, 0.0  ;;  %v2632_v47 = vpack.c.bf16 %v52_v27, %v51_v24 }
 0x3e7   :  { %v438_v7 = vadd.f32 %v437_v23, %v436_v11  ;;  %2094 = vmatprep.subr.bf16.mxu0 %v2626_v2 }
 0x3e8   :  { %v504_v32 = vadd.f32 %v503_v25, %v502_v17  ;;  %2095 = vmatpush3.bf16.msra.mxu0 %v2626_v2 }
 0x3e9   :  { %2250 = vrcp.f32 %v438_v7  ;;  %2096 = vmatprep.subr.bf16.mxu0 %v2632_v47 }
 0x3ea   :  { %v506_v35 = vadd.f32 %v505_v34, %v504_v32  ;;  %v613_v32 = vpack.c.bf16 %v2457_v29, %v2457_v29 }
 0x3ec   :  { %2097 = vmatpush3.bf16.msra.mxu0 %v2632_v47 }
 0x3ed   :  { %2110 = vmatprep.subr.bf16.mxu0 %v2383_v0 }
 0x3ee   :  { %v2249_v53 = vpop.eup %2248 }
 0x3ef   :  { %v507_v38 = vmul.f32 %v2249_v53, %v497_v33 }
 0x3f3   :  { %v2251_v39 = vpop.eup %2250 }
 0x3f4   :  { %v508_v40 = vmul.f32 %v2251_v39, %v506_v35  ;;  %v2656_v39 = vld [vmem:[#allocation5 + $0x98] ss:$0 sm:$0xff] }
 0x3f6   :  { %v509_v41 = vpack.c.bf16 %v508_v40, %v507_v38 }
 0x3f8   :  { %2091 = vmatmul.mubr.msk.bf16.vlgmr.msra.gmra.mrb[20].mxu1 %vm74_vm2, %v509_v41 }
 0x3f9   :  { %2103 = vmatpush3.bf16.msra.mxu1 %v2492_v6 }
 0x3fa   :  { %2104 = vmatprep.subr.bf16.mxu1 %v2495_v10 }
 0x3fd   :  { %2105 = vmatpush3.bf16.msra.mxu1 %v2495_v10 }
 0x3fe   :  { %2118 = vmatprep.subr.bf16.mxu1 %v2383_v0 }
 0x4cb   :  { %v559_v42 = vpop.f32.mrb[20].mxu1 }
 0x4cc   :  { %v560_v43 = vadd.f32 %v559_v42, %v2616_v55  ;;  %v2092_v44 = vpop.f32.mrb[21].mxu1 }
 0x4cd   :  { %v562_v58 = vpop.f32.mrb[22].mxu1 }
 0x4ce   :  { %v566_v59 = vmax.f32 %v560_v43, 0.0  ;;  %v563_v45 = vadd.f32 %v562_v58, %v2616_v55  ;;  %v2093_v60 = vpop.f32.mrb[23].mxu1 }
 0x4d0   :  { %v567_v61 = vmax.f32 %v563_v45, 0.0  ;;  %v568_v62 = vsel %vm74_vm2, %v566_v59, 0.0 }
 0x4d1   :  { %569 = vadd.xlane.f32.xlu0 %v568_v62 }
 0x4d2   :  { %v571_v48 = vsel %vm74_vm2, %v567_v61, 0.0 }
 0x4d3   :  { %572 = vadd.xlane.f32.xlu1 %v571_v48 }
 0x4e4   :  { %602 = vrot.lane.b32.xlu1 %v2622_v63, %s2386_s6 }
 0x55e   :  { %v570_v5 = vpop.xlane.xlu0 %569 }
 0x55f   :  { %v575_v13 = vmul.f32 0.03125, %v570_v5 }
 0x560   :  { %v573_v52 = vpop.xlane.xlu1 %572 }
 0x561   :  { %v577_v14 = vsub.f32 %v566_v59, %v575_v13  ;;  %v576_v15 = vmul.f32 0.03125, %v573_v52  ;;  %v2388_v59 = vmov 1966171168  }
 0x562   :  { %v674_v45 = vunpack.c.l.s4 %v2388_v59 }
 0x563   :  { %v578_v16 = vsub.f32 %v567_v61, %v576_v15  ;;  %v579_v18 = vmul.f32 %v577_v14, %v577_v14 }
 0x564   :  { %v2638_v51 = vpop.permute.xlu1 %602  ;;  %v675_v60 = vunpack.c.0.s8 %v674_v45 }
 0x565   :  { %v581_v20 = vsel %vm74_vm2, %v579_v18, 0.0  ;;  %v580_v54 = vmul.f32 %v578_v16, %v578_v16 }
 0x566   :  { %582 = vadd.xlane.f32.xlu0 %v581_v20  ;;  %v2674_v61 = vsub.s32 %v675_v60, %v2460_v36 }
 0x567   :  { %v584_v21 = vsel %vm74_vm2, %v580_v54, 0.0 }
 0x56a   :  { %585 = vadd.xlane.f32.xlu0 %v584_v21 }
 0x5f3   :  { %v583_v28 = vpop.xlane.xlu0 %582 }
 0x5f4   :  { %v587_v30 = vmul.f32 0.03125, %v583_v28 }
 0x5f6   :  { %v589_v19 = vadd.f32 1e-12, %v587_v30 }
 0x5f7   :  { %v586_v31 = vpop.xlane.xlu0 %585 }
 0x5f8   :  { %2252 = vrsqrt.f32 %v589_v19  ;;  %v588_v33 = vmul.f32 0.03125, %v586_v31 }
 0x5fa   :  { %v590_v3 = vadd.f32 1e-12, %v588_v33 }
 0x5fc   :  { %2254 = vrsqrt.f32 %v590_v3 }
 0x602   :  { %v2253_v49 = vpop.eup %2252 }
 0x603   :  { %v593_v11 = vmul.f32 %v2253_v49, %v577_v14 }
 0x605   :  { %v599_v22 = vmul.f32 %v2622_v63, %v593_v11 }
 0x606   :  { %v2255_v23 = vpop.eup %2254 }
 0x607   :  { %v594_v26 = vmul.f32 %v2255_v23, %v578_v16  ;;  %v605_v17 = vadd.f32 %v2638_v51, %v599_v22 }
 0x609   :  { %v600_v7 = vmul.f32 %v2622_v63, %v594_v26  ;;  %v1012_v35 = vrot.slane %v605_v17, %v2465_v37 }
 0x60b   :  { %v606_v25 = vadd.f32 %v2638_v51, %v600_v7 }
 0x60d   :  { %v2645_v34 = vpack.c.bf16 %v606_v25, %v605_v17  ;;  %v1016_v53 = vrot.slane %v606_v25, %v2465_v37 }
 0x60f   :  { %2098 = vmatprep.mubr.msk.bf16.mxu0 %vm74_vm2, %v2645_v34  ;;  %v2651_v38 = vpack.c.bf16 %v1016_v53, %v1012_v35 }
 0x610   :  { %2099 = vmatmul.mubr.msk.bf16.vlgmr.msra.gmra.mrb[24].mxu0 %vm74_vm2, %v613_v32 }
 0x611   :  { %2114 = vmatprep.mubr.msk.bf16.mxu0 %vm2384_vm0, %v2383_v0 }
 0x6e3   :  { %v2100_v40 = vpop.f32.mrb[24].mxu0 }
 0x6e4   :  { %v658_v29 = vpop.f32.mrb[25].mxu0  ;;  %v667_v58 = vadd.f32 %v2100_v40, %v2656_v39 }
 0x6e5   :  { %v659_v41 = vadd.f32 %v2656_v39, %v658_v29  ;;  %v2101_v42 = vpop.f32.mrb[26].mxu0 }
 0x6e6   :  { %v661_v43 = vpop.f32.mrb[27].mxu0  ;;  %v679_v62 = vrot.slane %v667_v58, %v2674_v61 }
 0x6e7   :  { %v662_v44 = vadd.f32 %v2656_v39, %v661_v43  ;;  %707 = vrot.lane.b32.xlu0 %v659_v41, %s2386_s6 }
 0x6e8   :  { %v680_v48 = vcombine.high %v679_v62, %v679_v62  ;;  %v687_v50 = vrot.slane %v679_v62, %v2674_v61 }
 0x6e9   :  { %709 = vrot.lane.b32.xlu1 %v662_v44, %s2386_s6 }
 0x6ea   :  { %v694_v1 = vrot.slane %v680_v48, %v2674_v61  ;;  %v698_v13 = vrot.slane %v687_v50, %v2465_v37 }
 0x6eb   :  { %863 = vrot.lane.b32.xlu0 %v659_v41, %s2387_s7 }
 0x6ec   :  { %v702_v52 = vrot.slane %v694_v1, %v2465_v37 }
 0x6ed   :  { %711 = vrot.lane.b32.xlu1 %v667_v58, %s2386_s6 }
 0x6ef   :  { %859 = vrot.lane.b32.xlu0 %v667_v58, %s2387_s7 }
 0x6f1   :  { %865 = vrot.lane.b32.xlu1 %v662_v44, %s2387_s7 }
 0x6f3   :  { %896 = vrot.lane.b32.xlu0 %v2632_v47, %s2385_s1 }
 0x6f5   :  { %894 = vrot.lane.b32.xlu1 %v2626_v2, %s2385_s1 }
 0x6f9   :  { %901 = vrot.lane.b32.xlu1 %v2656_v39, %s2385_s1 }
 0x759   :  { %v708_v5 = vpop.permute.xlu0 %707 }
 0x75a   :  { %v716_v15 = vmul.f32 %v708_v5, %v698_v13 }
 0x75b   :  { %v710_v14 = vpop.permute.xlu1 %709 }
 0x75c   :  { %v717_v16 = vmul.f32 %v710_v14, %v702_v52 }
 0x75d   :  { %v864_v21 = vpop.permute.xlu0 %863 }
 0x75e   :  { %v719_v18 = vpack.c.bf16 %v717_v16, %v716_v15 }
 0x75f   :  { %v712_v20 = vpop.permute.xlu1 %711 }
 0x760   :  { %v718_v54 = vmul.f32 %v712_v20, %v667_v58  ;;  %2106 = vmatprep.mubr.msk.bf16.mxu1 %vm74_vm2, %v719_v18 }
 0x761   :  { %v2695_v27 = vpop.permute.xlu0 %859 }
 0x762   :  { %v720_v36 = vpack.c.bf16 %v718_v54, %v718_v54 }
 0x763   :  { %v866_v24 = vpop.permute.xlu1 %865 }
 0x764   :  { %2107 = vmatmul.mubr.msk.bf16.vlgmr.msra.gmra.mrb[24].mxu1 %vm74_vm2, %v720_v36 }
 0x765   :  { %2119 = vmatpush3.bf16.msra.mxu1 %v2645_v34  ;;  %2120 = vmatprep.mubr.msk.bf16.mxu1 %vm2384_vm0, %v2383_v0 }
 0x766   :  { %2148 = vmatprep.subr.bf16.mxu1 %v2383_v0 }
 0x767   :  { %v2697_v28 = vpop.permute.xlu1 %894 }
 0x768   :  { %2111 = vmatpush3.bf16.msra.mxu0 %v2697_v28 }
 0x769   :  { %2112 = vmatprep.subr.bf16.mxu0 %v2383_v0 }
 0x76c   :  { %2121 = vmatmul.mubr.msk.bf16.vlgmr.msra.gmra.mrb[28].mxu1 %vm92_vm1, %v2438_v8  ;;  %v2701_v8 = vpop.permute.xlu0 %896 }
 0x76d   :  { %2149 = vmatpush3.bf16.msra.mxu1 %v2492_v6  ;;  %2152 = vmatprep.mubr.msk.bf16.mxu1 %vm2384_vm0, %v2383_v0 }
 0x76e   :  { %2150 = vmatprep.subr.bf16.mxu1 %v2383_v0  ;;  %2113 = vmatpush3.bf16.msra.mxu0 %v2701_v8 }
 0x76f   :  { %2124 = vmatprep.subr.bf16.mxu0 %v2383_v0 }
 0x771   :  { %2151 = vmatpush3.bf16.msra.mxu1 %v2495_v10 }
 0x772   :  { %2180 = vmatprep.subr.bf16.mxu1 %v2626_v2 }
 0x837   :  { %v2108_v30 = vpop.f32.mrb[24].mxu1 }
 0x838   :  { %v761_v19 = vpop.f32.mrb[25].mxu1  ;;  %v777_v45 = vmul.f32 0.35355338, %v2108_v30 }
 0x839   :  { %v775_v31 = vmul.f32 0.35355338, %v761_v19  ;;  %v2109_v33 = vpop.f32.mrb[26].mxu1 }
 0x83a   :  { %v764_v3 = vpop.f32.mrb[27].mxu1 }
 0x83b   :  { %v778_v49 = vsel %vm74_vm2, %v775_v31, -inf  ;;  %v776_v11 = vmul.f32 0.35355338, %v764_v3 }
 0x83c   :  { %v779_v22 = vrot.slane %v778_v49, 4 }
 0x83d   :  { %v785_v23 = vsel %vm74_vm2, %v776_v11, -inf }
 0x83e   :  { %v780_v26 = vmax.f32 %v778_v49, %v779_v22  ;;  %v786_v7 = vrot.slane %v785_v23, 4 }
 0x83f   :  { %v2707_v17 = vpop.f32.mrb[28].mxu1 }
 0x840   :  { %v781_v25 = vrot.slane %v780_v26, 2  ;;  %v787_v32 = vmax.f32 %v785_v23, %v786_v7  ;;  %v2122_v35 = vpop.f32.mrb[29].mxu1 }
 0x841   :  { %v2709_v53 = vpop.f32.mrb[30].mxu1 }
 0x842   :  { %v782_v0 = vmax.f32 %v780_v26, %v781_v25  ;;  %v788_v40 = vrot.slane %v787_v32, 2  ;;  %v1054_v29 = vpack.c.bf16 %v2709_v53, %v2707_v17  ;;  %v2123_v41 = vpop.f32.mrb[31].mxu1 }
 0x844   :  { %v783_v42 = vrot.slane %v782_v0, 1  ;;  %v789_v43 = vmax.f32 %v787_v32, %v788_v40 }
 0x846   :  { %v790_v44 = vrot.slane %v789_v43, 1  ;;  %v784_v58 = vmax.f32 %v782_v0, %v783_v42 }
 0x848   :  { %v791_v59 = vmax.f32 %v789_v43, %v790_v44 }
 0x84a   :  { %v794_v60 = vsel %vm609_vm3, %v791_v59, %v784_v58 }
 0x84b   :  { %v796_v62 = vmax.f32 %v777_v45, %v794_v60 }
 0x84d   :  { %v797_v48 = vsub.f32 %v777_v45, %v796_v62  ;;  %v807_v50 = vrot.slane %v796_v62, %v2674_v61 }
 0x84f   :  { %v808_v1 = vcombine.high %v807_v50, %v807_v50  ;;  %v815_v5 = vrot.slane %v807_v50, %v2674_v61  ;;  %v798_v36 = vmul.f32 1.442695, %v797_v48 }
 0x851   :  { %v822_v13 = vrot.slane %v808_v1, %v2674_v61  ;;  %v826_v52 = vrot.slane %v815_v5, %v2465_v37 }
 0x853   :  { %v830_v14 = vrot.slane %v822_v13, %v2465_v37  ;;  %v833_v15 = vsub.f32 %v775_v31, %v826_v52 }
 0x855   :  { %v834_v16 = vsub.f32 %v776_v11, %v830_v14  ;;  %v835_v18 = vmul.f32 1.442695, %v833_v15 }
 0x857   :  { %2256 = vpow2.f32 %v835_v18  ;;  %v837_v20 = vmul.f32 1.442695, %v834_v16 }
 0x859   :  { %2258 = vpow2.f32 %v837_v20 }
 0x85a   :  { %2260 = vpow2.f32 %v798_v36 }
 0x861   :  { %v2257_v54 = vpop.eup %2256 }
 0x862   :  { %v839_v30 = vsel %vm74_vm2, %v2257_v54, 0.0  ;;  %v869_v19 = vmul.f32 %v2257_v54, %v864_v21 }
 0x863   :  { %v2259_v33 = vpop.eup %2258  ;;  %v840_v3 = vrot.slane %v839_v30, 4 }
 0x864   :  { %v846_v49 = vsel %vm74_vm2, %v2259_v33, 0.0  ;;  %v870_v22 = vmul.f32 %v2259_v33, %v866_v24  ;;  %v871_v23 = vsel %vm74_vm2, %v869_v19, 0.0  ;;  %v2261_v62 = vpop.eup %2260 }
 0x865   :  { %v841_v26 = vadd.f32 %v840_v3, %v839_v30  ;;  %v847_v31 = vrot.slane %v846_v49, 4  ;;  %v872_v11 = vrot.slane %v871_v23, 4  ;;  %v862_v15 = vmul.f32 %v2261_v62, %v2695_v27  ;;  %v2728_v30 = vld [vmem:[#allocation7] sm:$0xff] }
 0x866   :  { %v878_v7 = vsel %vm74_vm2, %v870_v22, 0.0 }
 0x867   :  { %v842_v25 = vrot.slane %v841_v26, 2  ;;  %v848_v32 = vadd.f32 %v847_v31, %v846_v49  ;;  %v879_v35 = vrot.slane %v878_v7, 4  ;;  %v873_v0 = vadd.f32 %v872_v11, %v871_v23 }
 0x869   :  { %v843_v40 = vadd.f32 %v842_v25, %v841_v26  ;;  %v849_v41 = vrot.slane %v848_v32, 2  ;;  %v880_v21 = vadd.f32 %v879_v35, %v878_v7  ;;  %v874_v42 = vrot.slane %v873_v0, 2 }
 0x86b   :  { %v844_v43 = vrot.slane %v843_v40, 1  ;;  %v850_v44 = vadd.f32 %v849_v41, %v848_v32  ;;  %v881_v58 = vrot.slane %v880_v21, 2  ;;  %v875_v24 = vadd.f32 %v874_v42, %v873_v0 }
 0x86d   :  { %v851_v59 = vrot.slane %v850_v44, 1  ;;  %v882_v45 = vadd.f32 %v881_v58, %v880_v21  ;;  %v876_v60 = vrot.slane %v875_v24, 1  ;;  %v845_v48 = vadd.f32 %v844_v43, %v843_v40 }
 0x86f   :  { %v852_v50 = vadd.f32 %v851_v59, %v850_v44  ;;  %v883_v1 = vrot.slane %v882_v45, 1  ;;  %v877_v13 = vadd.f32 %v876_v60, %v875_v24 }
 0x871   :  { %v855_v5 = vsel %vm609_vm3, %v852_v50, %v845_v48  ;;  %v884_v52 = vadd.f32 %v883_v1, %v882_v45 }
 0x872   :  { %v857_v14 = vadd.f32 %v2261_v62, %v855_v5 }
 0x873   :  { %v887_v16 = vsel %vm609_vm3, %v884_v52, %v877_v13 }
 0x874   :  { %2262 = vrcp.f32 %v857_v14  ;;  %v889_v18 = vadd.f32 %v887_v16, %v862_v15 }
 0x87e   :  { %v2263_v20 = vpop.eup %2262 }
 0x87f   :  { %v890_v54 = vmul.f32 %v2263_v20, %v889_v18 }
 0x881   :  { %v891_v36 = vpack.c.bf16 %v890_v54, %v890_v54 }
 0x883   :  { %2115 = vmatmul.mubr.msk.bf16.vlgmr.msra.gmra.mrb[28].mxu0 %vm74_vm2, %v891_v36 }
 0x884   :  { %2125 = vmatpush3.bf16.msra.mxu0 %v2440_v9  ;;  %2128 = vmatprep.mubr.msk.bf16.mxu0 %vm2384_vm0, %v2728_v30  ;;  %v2757_v9 = vpop.permute.xlu1 %901 }
 0x885   :  { %2126 = vmatprep.subr.bf16.mxu0 %v2728_v30 }
 0x888   :  { %2127 = vmatpush3.bf16.msra.mxu0 %v2450_v12 }
 0x889   :  { %2172 = vmatprep.subr.bf16.mxu0 %v2728_v30 }
 0x88b   :  { %2129 = vmatmul.mubr.msk.bf16.vlgmr.msra.gmra.mrb[32].mxu0 %vm74_vm2, %v1054_v29 }
 0x88c   :  { %2173 = vmatpush3.bf16.msra.mxu0 %v2563_v56  ;;  %2132 = vmatprep.mubr.msk.bf16.mxu0 %vm2384_vm0, %v2728_v30 }
 0x88d   :  { %2174 = vmatprep.subr.bf16.mxu0 %v2728_v30 }
 0x890   :  { %2175 = vmatpush3.bf16.msra.mxu0 %v2567_v57 }
 0x891   :  { %2188 = vmatprep.subr.bf16.mxu0 %v2492_v6 }
 0x893   :  { %2133 = vmatmul.mubr.msk.bf16.gmra.mrb[36].mxu0 %vm74_vm2, %v2645_v34 }
 0x894   :  { %2136 = vmatprep.mubr.msk.bf16.mxu0 %vm2384_vm0, %v2728_v30 }
 0x89b   :  { %2137 = vmatmul.mubr.msk.bf16.gmra.mrb[40].mxu0 %vm74_vm2, %v2651_v38 }
 0x89c   :  { %2140 = vmatprep.mubr.msk.bf16.mxu0 %vm2384_vm0, %v2728_v30 }
 0x8a3   :  { %2141 = vmatmul.mubr.msk.bf16.gmra.mrb[44].mxu0 %vm74_vm2, %v2436_v4 }
 0x8a4   :  { %2144 = vmatprep.mubr.msk.bf16.mxu0 %vm2384_vm0, %v2728_v30 }
 0x956   :  { %v941_v12 = vpop.f32.mrb[28].mxu0 }
 0x957   :  { %v942_v56 = vadd.f32 %v941_v12, %v2757_v9  ;;  %v2116_v57 = vpop.f32.mrb[29].mxu0 }
 0x958   :  { %v944_v34 = vpop.f32.mrb[30].mxu0 }
 0x959   :  { %v947_v27 = vmax.f32 %v942_v56, 0.0  ;;  %v2117_v17 = vpop.f32.mrb[31].mxu0 }
 0x95b   :  { %v949_v38 = vsel %vm948_vm4, %v947_v27, 0.0 }
 0x95c   :  { %950 = vadd.xlane.f32.xlu0 %v949_v38 }
 0x95e   :  { %v1100_v53 = vpop.f32.mrb[32].mxu0 }
 0x95f   :  { %v2130_v29 = vpop.f32.mrb[33].mxu0 }
 0x960   :  { %v1103_v19 = vpop.f32.mrb[34].mxu0 }
 0x961   :  { %v2131_v4 = vpop.f32.mrb[35].mxu0 }
 0x966   :  { %v1108_v33 = vpop.f32.mrb[36].mxu0 }
 0x967   :  { %v2134_v3 = vpop.f32.mrb[37].mxu0  ;;  %v1109_v24 = vadd.f32 %v2483_v46, %v1108_v33 }
 0x968   :  { %v1111_v49 = vpop.f32.mrb[38].mxu0 }
 0x969   :  { %v2135_v22 = vpop.f32.mrb[39].mxu0 }
 0x96e   :  { %v1116_v23 = vpop.f32.mrb[40].mxu0 }
 0x96f   :  { %v2138_v26 = vpop.f32.mrb[41].mxu0 }
 0x970   :  { %v1119_v31 = vpop.f32.mrb[42].mxu0 }
 0x971   :  { %v2139_v11 = vpop.f32.mrb[43].mxu0 }
 0x976   :  { %v1124_v42 = vpop.f32.mrb[44].mxu0 }
 0x977   :  { %v2142_v43 = vpop.f32.mrb[45].mxu0 }
 0x978   :  { %v1127_v62 = vpop.f32.mrb[46].mxu0 }
 0x979   :  { %v2143_v50 = vpop.f32.mrb[47].mxu0 }
 0x9e9   :  { %v951_v7 = vpop.xlane.xlu0 %950 }
 0x9ea   :  { %v952_v25 = vmul.f32 0.03125, %v951_v7 }
 0x9ec   :  { %v953_v32 = vsub.f32 %v947_v27, %v952_v25 }
 0x9ee   :  { %v954_v35 = vmul.f32 %v953_v32, %v953_v32 }
 0x9f0   :  { %v955_v0 = vsel %vm948_vm4, %v954_v35, 0.0 }
 0x9f1   :  { %956 = vadd.xlane.f32.xlu1 %v955_v0 }
 0xa7e   :  { %v957_v40 = vpop.xlane.xlu1 %956 }
 0xa7f   :  { %v958_v41 = vmul.f32 0.03125, %v957_v40 }
 0xa81   :  { %v959_v21 = vadd.f32 1e-12, %v958_v41 }
 0xa83   :  { %2264 = vrsqrt.f32 %v959_v21 }
 0xa8d   :  { %v2265_v44 = vpop.eup %2264 }
 0xa8e   :  { %v961_v58 = vmul.f32 %v2265_v44, %v953_v32 }
 0xa90   :  { %963 = vrot.lane.b32.xlu0 %v961_v58, %s2387_s7 }
 0xa94   :  { %1141 = vrot.lane.b32.xlu0 %v1109_v24, %s2385_s1 }
 0xb02   :  { %v964_v59 = vpop.permute.xlu0 %963 }
 0xb03   :  { %v966_v45 = vmul.f32 %v2622_v63, %v964_v59  ;;  %v2305_v63 = vld [vmem:[#allocation5 + $0x90] ss:$0 sm:$0xff] }
 0xb04   :  { %v2776_v15 = vadd.f32 %v2305_v63, %v1111_v49  ;;  %v1101_v18 = vadd.f32 %v2305_v63, %v1100_v53  ;;  %v1104_v20 = vadd.f32 %v2305_v63, %v1103_v19  ;;  %v1128_v57 = vadd.f32 %v2305_v63, %v1127_v62 }
 0xb05   :  { %v2767_v60 = vadd.f32 %v966_v45, %v2638_v51  ;;  %v1120_v34 = vadd.f32 %v2305_v63, %v1119_v31  ;;  %v1125_v27 = vadd.f32 %v2305_v63, %v1124_v42  ;;  %v1117_v3 = vadd.f32 %v2305_v63, %v1116_v23 }
 0xb06   :  { %v1142_v12 = vpop.permute.xlu0 %1141 }
 0xb07   :  { %v1024_v48 = vrot.slane %v2767_v60, %v2674_v61  ;;  %v1149_v38 = vmul.f32 %v1142_v12, %v1109_v24  ;;  %v1147_v4 = vmul.f32 %v1142_v12, %v1101_v18  ;;  %v1151_v26 = vmul.f32 %v1142_v12, %v1117_v3 }
 0xb08   :  { %v1153_v31 = vmul.f32 %v1142_v12, %v1125_v27 }
 0xb09   :  { %v1025_v1 = vcombine.high %v1024_v48, %v1024_v48  ;;  %v1032_v5 = vrot.slane %v1024_v48, %v2674_v61 }
 0xb0b   :  { %v1039_v13 = vrot.slane %v1025_v1, %v2674_v61  ;;  %v1043_v46 = vrot.slane %v1032_v5, %v2465_v37 }
 0xb0d   :  { %v1047_v52 = vrot.slane %v1039_v13, %v2465_v37 }
 0xb0f   :  { %v2223_v14 = vpack.i.bf16 %v1047_v52, %v1043_v46 }
 0xb11   :  { %2224 = vrot.lane.b32.xlu1 %v2223_v14, %s2387_s7 }
 0xb15   :  { %1143 = vrot.lane.b32.xlu1 %v2776_v15, %s2385_s1 }
 0xb83   :  { %v2225_v16 = vpop.permute.xlu1 %2224 }
 0xb84   :  { %v2227_v54 = vunpack.i.h.bf16 %v2225_v16  ;;  %v2226_v36 = vunpack.i.l.bf16 %v2225_v16 }
 0xb86   :  { %v1056_v56 = vpack.c.bf16 %v2227_v54, %v2226_v36 }
 0xb87   :  { %v1144_v17 = vpop.permute.xlu1 %1143 }
 0xb88   :  { %2145 = vmatmul.mubr.msk.bf16.gmra.mrb[48].mxu0 %vm74_vm2, %v1056_v56  ;;  %v1150_v29 = vmul.f32 %v1144_v17, %v2776_v15  ;;  %v1148_v33 = vmul.f32 %v1144_v17, %v1104_v20  ;;  %v1152_v49 = vmul.f32 %v1144_v17, %v1120_v34  ;;  %v1154_v22 = vmul.f32 %v1144_v17, %v1128_v57 }
 0xb89   :  { %2176 = vmatprep.mubr.msk.bf16.mxu0 %vm2384_vm0, %v2728_v30 }
 0xb8a   :  { %v1158_v53 = vpack.c.bf16 %v1150_v29, %v1149_v38  ;;  %v1157_v19 = vpack.c.bf16 %v1148_v33, %v1147_v4  ;;  %v1159_v11 = vpack.c.bf16 %v1152_v49, %v1151_v26  ;;  %v1160_v7 = vpack.c.bf16 %v1154_v22, %v1153_v31 }
 0xb8c   :  { %1169 = vrot.lane.b32.xlu1 %v1158_v53, %s2386_s6  ;;  %1167 = vrot.lane.b32.xlu0 %v1157_v19, %s2386_s6 }
 0xb90   :  { %1171 = vrot.lane.b32.xlu0 %v1159_v11, %s2386_s6  ;;  %1173 = vrot.lane.b32.xlu1 %v1160_v7, %s2386_s6 }
 0xb94   :  { %1351 = vrot.lane.b32.xlu1 %v1101_v18, %s2387_s7 }
 0xb98   :  { %1355 = vrot.lane.b32.xlu1 %v1109_v24, %s2387_s7 }
 0xb9c   :  { %1359 = vrot.lane.b32.xlu1 %v1117_v3, %s2387_s7 }
 0xba0   :  { %1363 = vrot.lane.b32.xlu1 %v1125_v27, %s2387_s7 }
 0xbfe   :  { %v1168_v23 = vpop.permute.xlu0 %1167  ;;  %v1170_v25 = vpop.permute.xlu1 %1169 }
 0xbff   :  { %2153 = vmatmul.mubr.msk.bf16.vlgmr.msra.gmra.mrb[32].mxu1 %vm74_vm2, %v1168_v23 }
 0xc00   :  { %2156 = vmatprep.mubr.msk.bf16.mxu1 %vm2384_vm0, %v2728_v30  ;;  %2181 = vmatpush3.bf16.msra.mxu1 %v2626_v2 }
 0xc01   :  { %2182 = vmatprep.subr.bf16.mxu1 %v2632_v47 }
 0xc02   :  { %v1172_v32 = vpop.permute.xlu0 %1171  ;;  %v1174_v35 = vpop.permute.xlu1 %1173 }
 0xc04   :  { %2183 = vmatpush3.bf16.msra.mxu1 %v2632_v47 }
 0xc05   :  { %2196 = vmatprep.subr.bf16.mxu1 %v2728_v30 }
 0xc07   :  { %2157 = vmatmul.mubr.msk.bf16.gmra.mrb[36].mxu1 %vm74_vm2, %v1170_v25 }
 0xc08   :  { %2160 = vmatprep.mubr.msk.bf16.mxu1 %vm2384_vm0, %v2728_v30 }
 0xc0f   :  { %2161 = vmatmul.mubr.msk.bf16.gmra.mrb[40].mxu1 %vm74_vm2, %v1172_v32 }
 0xc10   :  { %2164 = vmatprep.mubr.msk.bf16.mxu1 %vm2384_vm0, %v2728_v30 }
 0xc17   :  { %2165 = vmatmul.mubr.msk.bf16.gmra.mrb[44].mxu1 %vm74_vm2, %v1174_v35 }
 0xc18   :  { %2168 = vmatprep.mubr.msk.bf16.mxu1 %vm2384_vm0, %v2728_v30 }
 0xc5b   :  { %v1132_v2 = vpop.f32.mrb[48].mxu0 }
 0xc5c   :  { %v1133_v47 = vadd.f32 %v2305_v63, %v1132_v2  ;;  %v2146_v0 = vpop.f32.mrb[49].mxu0 }
 0xc5d   :  { %v1135_v40 = vpop.f32.mrb[50].mxu0 }
 0xc5e   :  { %v1136_v41 = vadd.f32 %v2305_v63, %v1135_v40  ;;  %1367 = vrot.lane.b32.xlu1 %v1133_v47, %s2387_s7  ;;  %v2147_v21 = vpop.f32.mrb[51].mxu0  ;;  %v1155_v42 = vmul.f32 %v1142_v12, %v1133_v47 }
 0xc5f   :  { %v1352_v21 = vpop.permute.xlu1 %1351 }
 0xc60   :  { %v1156_v43 = vmul.f32 %v1144_v17, %v1136_v41 }
 0xc62   :  { %v1161_v44 = vpack.c.bf16 %v1156_v43, %v1155_v42 }
 0xc64   :  { %1175 = vrot.lane.b32.xlu0 %v1161_v44, %s2386_s6 }
 0xc68   :  { %1353 = vrot.lane.b32.xlu0 %v1104_v20, %s2387_s7 }
 0xc6c   :  { %1357 = vrot.lane.b32.xlu0 %v2776_v15, %s2387_s7 }
 0xc70   :  { %1361 = vrot.lane.b32.xlu0 %v1120_v34, %s2387_s7 }
 0xc74   :  { %1365 = vrot.lane.b32.xlu0 %v1128_v57, %s2387_s7 }
 0xc78   :  { %1369 = vrot.lane.b32.xlu0 %v1136_v41, %s2387_s7 }
 0xcd2   :  { %v1226_v58 = vpop.f32.mrb[32].mxu1 }
 0xcd3   :  { %v2154_v24 = vpop.f32.mrb[33].mxu1  ;;  %v1265_v13 = vmul.f32 0.35355338, %v1226_v58 }
 0xcd4   :  { %v1229_v59 = vpop.f32.mrb[34].mxu1 }
 0xcd5   :  { %v2155_v45 = vpop.f32.mrb[35].mxu1  ;;  %v1266_v52 = vmul.f32 0.35355338, %v1229_v59  ;;  %v1275_v16 = vsel %vm74_vm2, %v1265_v13, -inf }
 0xcd6   :  { %v1176_v62 = vpop.permute.xlu0 %1175 }
 0xcd7   :  { %2169 = vmatmul.mubr.msk.bf16.gmra.mrb[48].mxu1 %vm74_vm2, %v1176_v62  ;;  %v1284_v12 = vsel %vm74_vm2, %v1266_v52, -inf }
 0xcda   :  { %v1234_v48 = vpop.f32.mrb[36].mxu1  ;;  %v1354_v45 = vpop.permute.xlu0 %1353 }
 0xcdb   :  { %v2158_v50 = vpop.f32.mrb[37].mxu1  ;;  %v1267_v34 = vmul.f32 0.35355338, %v1234_v48 }
 0xcdc   :  { %v1237_v1 = vpop.f32.mrb[38].mxu1 }
 0xcdd   :  { %v2159_v5 = vpop.f32.mrb[39].mxu1  ;;  %v1268_v17 = vmul.f32 0.35355338, %v1237_v1  ;;  %v1276_v33 = vsel %vm74_vm2, %v1267_v34, -inf }
 0xcdf   :  { %v1285_v22 = vsel %vm74_vm2, %v1268_v17, -inf }
 0xce2   :  { %v1242_v46 = vpop.f32.mrb[40].mxu1 }
 0xce3   :  { %v1269_v14 = vmul.f32 0.35355338, %v1242_v46  ;;  %v2162_v63 = vpop.f32.mrb[41].mxu1 }
 0xce4   :  { %v1245_v15 = vpop.f32.mrb[42].mxu1 }
 0xce5   :  { %v1277_v18 = vsel %vm74_vm2, %v1269_v14, -inf  ;;  %v1270_v20 = vmul.f32 0.35355338, %v1245_v15  ;;  %v2163_v54 = vpop.f32.mrb[43].mxu1 }
 0xce6   :  { %v1278_v36 = vmax.f32 %v1275_v16, %v1277_v18  ;;  %v1356_v54 = vpop.permute.xlu1 %1355 }
 0xce7   :  { %v1286_v56 = vsel %vm74_vm2, %v1270_v20, -inf }
 0xce8   :  { %v1287_v57 = vmax.f32 %v1284_v12, %v1286_v56  ;;  %v1358_v12 = vpop.permute.xlu0 %1357 }
 0xcea   :  { %v1250_v27 = vpop.f32.mrb[44].mxu1 }
 0xceb   :  { %v1271_v38 = vmul.f32 0.35355338, %v1250_v27  ;;  %v2166_v29 = vpop.f32.mrb[45].mxu1 }
 0xcec   :  { %v1253_v4 = vpop.f32.mrb[46].mxu1 }
 0xced   :  { %v1279_v3 = vsel %vm74_vm2, %v1271_v38, -inf  ;;  %v1272_v53 = vmul.f32 0.35355338, %v1253_v4  ;;  %v2167_v19 = vpop.f32.mrb[47].mxu1 }
 0xcee   :  { %v1280_v49 = vmax.f32 %v1276_v33, %v1279_v3 }
 0xcef   :  { %v1288_v26 = vsel %vm74_vm2, %v1272_v53, -inf }
 0xcf0   :  { %v1289_v31 = vmax.f32 %v1285_v22, %v1288_v26 }
 0xdaa   :  { %v1258_v11 = vpop.f32.mrb[48].mxu1 }
 0xdab   :  { %v1273_v7 = vmul.f32 0.35355338, %v1258_v11  ;;  %v2170_v23 = vpop.f32.mrb[49].mxu1 }
 0xdac   :  { %v1261_v25 = vpop.f32.mrb[50].mxu1 }
 0xdad   :  { %v1281_v32 = vsel %vm74_vm2, %v1273_v7, -inf  ;;  %v1274_v35 = vmul.f32 0.35355338, %v1261_v25  ;;  %v2171_v2 = vpop.f32.mrb[51].mxu1 }
 0xdae   :  { %v1282_v47 = vmax.f32 %v1278_v36, %v1281_v32 }
 0xdaf   :  { %v1290_v0 = vsel %vm74_vm2, %v1274_v35, -inf }
 0xdb0   :  { %v1283_v40 = vmax.f32 %v1282_v47, %v1280_v49  ;;  %v1291_v41 = vmax.f32 %v1287_v57, %v1290_v0 }
 0xdb2   :  { %v1293_v42 = vsub.f32 %v1265_v13, %v1283_v40  ;;  %v1295_v43 = vsub.f32 %v1267_v34, %v1283_v40  ;;  %v1297_v44 = vsub.f32 %v1269_v14, %v1283_v40  ;;  %v1299_v58 = vsub.f32 %v1271_v38, %v1283_v40  ;;  %v1360_v34 = vpop.permute.xlu1 %1359 }
 0xdb3   :  { %v1301_v24 = vsub.f32 %v1273_v7, %v1283_v40  ;;  %v1292_v59 = vmax.f32 %v1291_v41, %v1289_v31 }
 0xdb4   :  { %v1303_v62 = vmul.f32 1.442695, %v1293_v42  ;;  %v1307_v48 = vmul.f32 1.442695, %v1295_v43  ;;  %v1311_v50 = vmul.f32 1.442695, %v1297_v44 }
 0xdb5   :  { %v1315_v1 = vmul.f32 1.442695, %v1299_v58  ;;  %v1319_v5 = vmul.f32 1.442695, %v1301_v24  ;;  %v1294_v46 = vsub.f32 %v1266_v52, %v1292_v59  ;;  %v1296_v63 = vsub.f32 %v1268_v17, %v1292_v59 }
 0xdb6   :  { %2266 = vpow2.f32 %v1303_v62  ;;  %v1298_v15 = vsub.f32 %v1270_v20, %v1292_v59  ;;  %v1300_v16 = vsub.f32 %v1272_v53, %v1292_v59  ;;  %v1302_v18 = vsub.f32 %v1274_v35, %v1292_v59  ;;  %v1362_v20 = vpop.permute.xlu0 %1361  ;;  %v1364_v17 = vpop.permute.xlu1 %1363 }
 0xdb7   :  { %2268 = vpow2.f32 %v1307_v48  ;;  %v1305_v13 = vmul.f32 1.442695, %v1294_v46  ;;  %v1309_v14 = vmul.f32 1.442695, %v1296_v63 }
 0xdb8   :  { %2270 = vpow2.f32 %v1311_v50  ;;  %v1313_v36 = vmul.f32 1.442695, %v1298_v15  ;;  %v1317_v56 = vmul.f32 1.442695, %v1300_v16  ;;  %v1321_v57 = vmul.f32 1.442695, %v1302_v18 }
 0xdb9   :  { %2272 = vpow2.f32 %v1315_v1 }
 0xdba   :  { %2274 = vpow2.f32 %v1319_v5  ;;  %v1368_v25 = vpop.permute.xlu1 %1367  ;;  %v1366_v0 = vpop.permute.xlu0 %1365 }
 0xdbb   :  { %2276 = vpow2.f32 %v1305_v13 }
 0xdbc   :  { %2278 = vpow2.f32 %v1309_v14 }
 0xdbd   :  { %2280 = vpow2.f32 %v1313_v36 }
 0xdbe   :  { %2282 = vpow2.f32 %v1317_v56 }
 0xdbf   :  { %2284 = vpow2.f32 %v1321_v57  ;;  %v1370_v57 = vpop.permute.xlu0 %1369 }
 0xdc0   :  { %v2267_v52 = vpop.eup %2266 }
 0xdc1   :  { %v2269_v27 = vpop.eup %2268  ;;  %v1323_v38 = vsel %vm74_vm2, %v2267_v52, 0.0  ;;  %v1381_v29 = vmul.f32 %v2267_v52, %v1352_v21 }
 0xdc2   :  { %v2271_v4 = vpop.eup %2270  ;;  %v1324_v33 = vsel %vm74_vm2, %v2269_v27, 0.0  ;;  %v1383_v3 = vmul.f32 %v2269_v27, %v1356_v54 }
 0xdc3   :  { %v2273_v53 = vpop.eup %2272  ;;  %v1325_v19 = vadd.f32 %v1324_v33, %v1323_v38  ;;  %v1385_v49 = vmul.f32 %v2271_v4, %v1360_v34  ;;  %v1391_v22 = vsel %vm74_vm2, %v1381_v29, 0.0  ;;  %v1326_v31 = vsel %vm74_vm2, %v2271_v4, 0.0 }
 0xdc4   :  { %v2275_v26 = vpop.eup %2274  ;;  %v1387_v11 = vmul.f32 %v2273_v53, %v1364_v17  ;;  %v1392_v7 = vsel %vm74_vm2, %v1383_v3, 0.0  ;;  %v1328_v35 = vsel %vm74_vm2, %v2273_v53, 0.0 }
 0xdc5   :  { %v2277_v23 = vpop.eup %2276  ;;  %v1327_v32 = vadd.f32 %v1326_v31, %v1325_v19  ;;  %v1393_v2 = vadd.f32 %v1392_v7, %v1391_v22  ;;  %v1389_v40 = vmul.f32 %v2275_v26, %v1368_v25  ;;  %v1394_v41 = vsel %vm74_vm2, %v1385_v49, 0.0 }
 0xdc6   :  { %v2279_v47 = vpop.eup %2278  ;;  %v1332_v21 = vsel %vm74_vm2, %v2277_v23, 0.0  ;;  %v1382_v42 = vmul.f32 %v2277_v23, %v1354_v45  ;;  %v1330_v62 = vsel %vm74_vm2, %v2275_v26, 0.0  ;;  %v1396_v48 = vsel %vm74_vm2, %v1387_v11, 0.0 }
 0xdc7   :  { %v2281_v43 = vpop.eup %2280  ;;  %v1329_v44 = vadd.f32 %v1328_v35, %v1327_v32  ;;  %v1395_v58 = vadd.f32 %v1394_v41, %v1393_v2  ;;  %v1333_v24 = vsel %vm74_vm2, %v2279_v47, 0.0  ;;  %v1384_v1 = vmul.f32 %v2279_v47, %v1358_v12 }
 0xdc8   :  { %v2283_v59 = vpop.eup %2282  ;;  %v1334_v50 = vadd.f32 %v1333_v24, %v1332_v21  ;;  %v1335_v63 = vsel %vm74_vm2, %v2281_v43, 0.0  ;;  %v1386_v15 = vmul.f32 %v2281_v43, %v1362_v20  ;;  %v1398_v45 = vsel %vm74_vm2, %v1389_v40, 0.0 }
 0xdc9   :  { %v1331_v5 = vadd.f32 %v1330_v62, %v1329_v44  ;;  %v1397_v46 = vadd.f32 %v1396_v48, %v1395_v58  ;;  %v2285_v16 = vpop.eup %2284  ;;  %v1337_v54 = vsel %vm74_vm2, %v2283_v59, 0.0  ;;  %v1400_v13 = vsel %vm74_vm2, %v1382_v42, 0.0 }
 0xdca   :  { %v1336_v18 = vadd.f32 %v1335_v63, %v1334_v50  ;;  %v1388_v36 = vmul.f32 %v2283_v59, %v1366_v0  ;;  %v1401_v56 = vsel %vm74_vm2, %v1384_v1, 0.0  ;;  %v1339_v52 = vsel %vm74_vm2, %v2285_v16, 0.0 }
 0xdcb   :  { %2286 = vrcp.f32 %v1331_v5  ;;  %v1399_v14 = vadd.f32 %v1398_v45, %v1397_v46  ;;  %v1402_v34 = vadd.f32 %v1401_v56, %v1400_v13  ;;  %v1390_v27 = vmul.f32 %v2285_v16, %v1370_v57  ;;  %v2860_v16 = vld [vmem:[#allocation5 + $0xa0] ss:$0 sm:$0xff] }
 0xdcc   :  { %v1338_v12 = vadd.f32 %v1337_v54, %v1336_v18  ;;  %v1403_v20 = vsel %vm74_vm2, %v1386_v15, 0.0  ;;  %v1405_v29 = vsel %vm74_vm2, %v1388_v36, 0.0 }
 0xdcd   :  { %v1404_v38 = vadd.f32 %v1403_v20, %v1402_v34  ;;  %v1407_v33 = vsel %vm74_vm2, %v1390_v27, 0.0 }
 0xdce   :  { %v1340_v17 = vadd.f32 %v1339_v52, %v1338_v12 }
 0xdcf   :  { %v1406_v4 = vadd.f32 %v1405_v29, %v1404_v38 }
 0xdd0   :  { %2288 = vrcp.f32 %v1340_v17 }
 0xdd1   :  { %v1408_v3 = vadd.f32 %v1407_v33, %v1406_v4 }
 0xdd5   :  { %v2287_v53 = vpop.eup %2286 }
 0xdd6   :  { %v1409_v19 = vmul.f32 %v2287_v53, %v1399_v14 }
 0xdda   :  { %v2289_v49 = vpop.eup %2288 }
 0xddb   :  { %v1410_v22 = vmul.f32 %v2289_v49, %v1408_v3 }
 0xddd   :  { %v1411_v26 = vpack.c.bf16 %v1410_v22, %v1409_v19 }
 0xddf   :  { %2177 = vmatmul.mubr.msk.bf16.vlgmr.msra.gmra.mrb[52].mxu0 %vm74_vm2, %v1411_v26 }
 0xde0   :  { %2189 = vmatpush3.bf16.msra.mxu0 %v2492_v6 }
 0xde1   :  { %2190 = vmatprep.subr.bf16.mxu0 %v2495_v10 }
 0xde4   :  { %2191 = vmatpush3.bf16.msra.mxu0 %v2495_v10 }
 0xde5   :  { %2204 = vmatprep.subr.bf16.mxu0 %v2728_v30 }
 0xeb2   :  { %v1449_v31 = vpop.f32.mrb[52].mxu0 }
 0xeb3   :  { %v1450_v11 = vadd.f32 %v1449_v31, %v2616_v55  ;;  %v2178_v7 = vpop.f32.mrb[53].mxu0 }
 0xeb4   :  { %v1452_v23 = vpop.f32.mrb[54].mxu0 }
 0xeb5   :  { %v1456_v25 = vmax.f32 %v1450_v11, 0.0  ;;  %v1453_v32 = vadd.f32 %v1452_v23, %v2616_v55  ;;  %v2179_v35 = vpop.f32.mrb[55].mxu0 }
 0xeb7   :  { %v1457_v2 = vmax.f32 %v1453_v32, 0.0  ;;  %v1458_v47 = vsel %vm74_vm2, %v1456_v25, 0.0 }
 0xeb8   :  { %1459 = vadd.xlane.f32.xlu1 %v1458_v47 }
 0xeb9   :  { %v1461_v6 = vsel %vm74_vm2, %v1457_v2, 0.0 }
 0xeba   :  { %1462 = vadd.xlane.f32.xlu0 %v1461_v6 }
 0xf45   :  { %v1460_v0 = vpop.xlane.xlu1 %1459 }
 0xf46   :  { %v1464_v10 = vmul.f32 0.03125, %v1460_v0 }
 0xf47   :  { %v1463_v40 = vpop.xlane.xlu0 %1462 }
 0xf48   :  { %v1466_v41 = vsub.f32 %v1456_v25, %v1464_v10  ;;  %v1465_v21 = vmul.f32 0.03125, %v1463_v40 }
 0xf4a   :  { %v1467_v42 = vsub.f32 %v1457_v2, %v1465_v21  ;;  %v1468_v43 = vmul.f32 %v1466_v41, %v1466_v41 }
 0xf4c   :  { %v1470_v44 = vsel %vm74_vm2, %v1468_v43, 0.0  ;;  %v1469_v58 = vmul.f32 %v1467_v42, %v1467_v42 }
 0xf4d   :  { %1471 = vadd.xlane.f32.xlu0 %v1470_v44 }
 0xf4e   :  { %v1473_v55 = vsel %vm74_vm2, %v1469_v58, 0.0 }
 0xf4f   :  { %1474 = vadd.xlane.f32.xlu1 %v1473_v55 }
 0xf63   :  { %1488 = vrot.lane.b32.xlu0 %v2767_v60, %s2387_s7 }
 0xfda   :  { %v1472_v24 = vpop.xlane.xlu0 %1471 }
 0xfdb   :  { %v1476_v59 = vmul.f32 0.03125, %v1472_v24 }
 0xfdc   :  { %v1475_v62 = vpop.xlane.xlu1 %1474 }
 0xfdd   :  { %v1478_v48 = vadd.f32 1e-12, %v1476_v59  ;;  %v1477_v50 = vmul.f32 0.03125, %v1475_v62 }
 0xfde   :  { %v1489_v54 = vpop.permute.xlu0 %1488 }
 0xfdf   :  { %2290 = vrsqrt.f32 %v1478_v48  ;;  %v1479_v1 = vadd.f32 1e-12, %v1477_v50  ;;  %v1492_v36 = vpack.c.bf16 %v1489_v54, %v1489_v54 }
 0xfe1   :  { %2292 = vrsqrt.f32 %v1479_v1 }
 0xfe9   :  { %v2291_v5 = vpop.eup %2290 }
 0xfea   :  { %v1482_v46 = vmul.f32 %v2291_v5, %v1466_v41 }
 0xfeb   :  { %v2293_v63 = vpop.eup %2292 }
 0xfec   :  { %v1483_v15 = vmul.f32 %v2293_v63, %v1467_v42  ;;  %v1484_v45 = vmul.f32 %v2860_v16, %v1482_v46 }
 0xfee   :  { %v1485_v18 = vmul.f32 %v2860_v16, %v1483_v15  ;;  %v2865_v60 = vadd.f32 %v1484_v45, %v2638_v51 }
 0xff0   :  { %v2868_v13 = vadd.f32 %v1485_v18, %v2638_v51 }
 0xff2   :  { %v1491_v14 = vpack.c.bf16 %v2868_v13, %v2865_v60 }
 0xff4   :  { %2184 = vmatprep.mubr.msk.bf16.mxu1 %vm74_vm2, %v1491_v14 }
 0xff5   :  { %2185 = vmatmul.mubr.msk.bf16.vlgmr.msra.gmra.mrb[52].mxu1 %vm74_vm2, %v1492_v36 }
 0xff6   :  { %2197 = vmatpush3.bf16.msra.mxu1 %v2697_v28  ;;  %2200 = vmatprep.mubr.msk.bf16.mxu1 %vm2384_vm0, %v2728_v30 }
 0xff7   :  { %2198 = vmatprep.subr.bf16.mxu1 %v2728_v30 }
 0xffa   :  { %2199 = vmatpush3.bf16.msra.mxu1 %v2701_v8 }
0x10c8   :  { %v2186_v56 = vpop.f32.mrb[52].mxu1 }
0x10c9   :  { %v1542_v57 = vadd.f32 %v2186_v56, %v2656_v39  ;;  %v1533_v12 = vpop.f32.mrb[53].mxu1 }
0x10ca   :  { %v1534_v34 = vadd.f32 %v2656_v39, %v1533_v12  ;;  %v2187_v52 = vpop.f32.mrb[54].mxu1 }
0x10cb   :  { %1586 = vrot.lane.b32.xlu0 %v1542_v57, %s2386_s6  ;;  %v1536_v27 = vpop.f32.mrb[55].mxu1  ;;  %v1554_v28 = vrot.slane %v1542_v57, %v2674_v61 }
0x10cc   :  { %v1537_v20 = vadd.f32 %v2656_v39, %v1536_v27  ;;  %1582 = vrot.lane.b32.xlu1 %v1534_v34, %s2386_s6 }
0x10cd   :  { %v1555_v8 = vcombine.high %v1554_v28, %v1554_v28  ;;  %v1562_v17 = vrot.slane %v1554_v28, %v2674_v61 }
0x10cf   :  { %1740 = vrot.lane.b32.xlu0 %v1537_v20, %s2387_s7  ;;  %v1569_v38 = vrot.slane %v1555_v8, %v2674_v61  ;;  %v1573_v39 = vrot.slane %v1562_v17, %v2465_v37 }
0x10d0   :  { %1584 = vrot.lane.b32.xlu1 %v1537_v20, %s2386_s6 }
0x10d1   :  { %v1577_v33 = vrot.slane %v1569_v38, %v2465_v37 }
0x10d4   :  { %1738 = vrot.lane.b32.xlu1 %v1534_v34, %s2387_s7 }
0x10d8   :  { %1734 = vrot.lane.b32.xlu1 %v1542_v57, %s2387_s7 }
0x113d   :  { %v1587_v4 = vpop.permute.xlu0 %1586 }
0x113e   :  { %v1583_v29 = vpop.permute.xlu1 %1582  ;;  %v1593_v3 = vmul.f32 %v1587_v4, %v1542_v57 }
0x113f   :  { %v1591_v19 = vmul.f32 %v1583_v29, %v1573_v39 }
0x1140   :  { %v1595_v26 = vpack.c.bf16 %v1593_v3, %v1593_v3 }
0x1141   :  { %v1741_v27 = vpop.permute.xlu0 %1740 }
0x1142   :  { %v1585_v53 = vpop.permute.xlu1 %1584 }
0x1143   :  { %v1592_v49 = vmul.f32 %v1585_v53, %v1577_v33 }
0x1145   :  { %v1594_v22 = vpack.c.bf16 %v1592_v49, %v1591_v19 }
0x1146   :  { %v1739_v56 = vpop.permute.xlu1 %1738 }
0x1147   :  { %2192 = vmatprep.mubr.msk.bf16.mxu0 %vm74_vm2, %v1594_v22 }
0x1148   :  { %2193 = vmatmul.mubr.msk.bf16.vlgmr.msra.gmra.mrb[56].mxu0 %vm74_vm2, %v1595_v26 }
0x1149   :  { %2208 = vmatprep.mubr.msk.bf16.mxu0 %vm2384_vm0, %v2728_v30 }
0x121b   :  { %v2194_v31 = vpop.f32.mrb[56].mxu0 }
0x121c   :  { %v1636_v11 = vpop.f32.mrb[57].mxu0  ;;  %v1652_v24 = vmul.f32 0.35355338, %v2194_v31 }
0x121d   :  { %v1650_v7 = vmul.f32 0.35355338, %v1636_v11  ;;  %v2195_v23 = vpop.f32.mrb[58].mxu0 }
0x121e   :  { %v1639_v25 = vpop.f32.mrb[59].mxu0 }
0x121f   :  { %v1653_v32 = vsel %vm74_vm2, %v1650_v7, -inf  ;;  %v1651_v35 = vmul.f32 0.35355338, %v1639_v25 }
0x1220   :  { %v1654_v2 = vrot.slane %v1653_v32, 4 }
0x1221   :  { %v1660_v47 = vsel %vm74_vm2, %v1651_v35, -inf }
0x1222   :  { %v1655_v6 = vmax.f32 %v1653_v32, %v1654_v2  ;;  %v1661_v0 = vrot.slane %v1660_v47, 4 }
0x1224   :  { %v1656_v10 = vrot.slane %v1655_v6, 2  ;;  %v1662_v40 = vmax.f32 %v1660_v47, %v1661_v0  ;;  %v1735_v0 = vpop.permute.xlu1 %1734 }
0x1226   :  { %v1657_v41 = vmax.f32 %v1655_v6, %v1656_v10  ;;  %v1663_v21 = vrot.slane %v1662_v40, 2 }
0x1228   :  { %v1658_v42 = vrot.slane %v1657_v41, 1  ;;  %v1664_v43 = vmax.f32 %v1662_v40, %v1663_v21 }
0x122a   :  { %v1665_v44 = vrot.slane %v1664_v43, 1  ;;  %v1659_v58 = vmax.f32 %v1657_v41, %v1658_v42 }
0x122c   :  { %v1666_v55 = vmax.f32 %v1664_v43, %v1665_v44 }
0x122e   :  { %v1669_v59 = vsel %vm609_vm3, %v1666_v55, %v1659_v58 }
0x122f   :  { %v1671_v62 = vmax.f32 %v1652_v24, %v1669_v59 }
0x1231   :  { %v1672_v48 = vsub.f32 %v1652_v24, %v1671_v62  ;;  %v1682_v50 = vrot.slane %v1671_v62, %v2674_v61 }
0x1233   :  { %v1683_v1 = vcombine.high %v1682_v50, %v1682_v50  ;;  %v1690_v5 = vrot.slane %v1682_v50, %v2674_v61  ;;  %v1673_v57 = vmul.f32 1.442695, %v1672_v48 }
0x1235   :  { %v1697_v46 = vrot.slane %v1683_v1, %v2674_v61  ;;  %v1701_v63 = vrot.slane %v1690_v5, %v2465_v37 }
0x1237   :  { %v1705_v15 = vrot.slane %v1697_v46, %v2465_v37  ;;  %v1708_v45 = vsub.f32 %v1650_v7, %v1701_v63 }
0x1239   :  { %v1709_v18 = vsub.f32 %v1651_v35, %v1705_v15  ;;  %v1710_v54 = vmul.f32 1.442695, %v1708_v45 }
0x123b   :  { %2294 = vpow2.f32 %v1710_v54  ;;  %v1712_v14 = vmul.f32 1.442695, %v1709_v18 }
0x123d   :  { %2296 = vpow2.f32 %v1712_v14 }
0x123e   :  { %2298 = vpow2.f32 %v1673_v57 }
0x1245   :  { %v2295_v36 = vpop.eup %2294 }
0x1246   :  { %v1714_v12 = vsel %vm74_vm2, %v2295_v36, 0.0  ;;  %v1744_v34 = vmul.f32 %v2295_v36, %v1739_v56 }
0x1247   :  { %v2297_v52 = vpop.eup %2296  ;;  %v1715_v20 = vrot.slane %v1714_v12, 4 }
0x1248   :  { %v1721_v61 = vsel %vm74_vm2, %v2297_v52, 0.0  ;;  %v1745_v28 = vmul.f32 %v2297_v52, %v1741_v27  ;;  %v1746_v37 = vsel %vm74_vm2, %v1744_v34, 0.0  ;;  %v2299_v35 = vpop.eup %2298  ;;  %v56_v34 = vld [vmem:[#allocation5 + $0x48] sm:$0xff] }
0x1249   :  { %v1716_v8 = vadd.f32 %v1715_v20, %v1714_v12  ;;  %v1722_v17 = vrot.slane %v1721_v61, 4  ;;  %v1747_v38 = vrot.slane %v1746_v37, 4  ;;  %v1737_v42 = vmul.f32 %v2299_v35, %v1735_v0  ;;  %v55_v12 = vld [vmem:[#allocation5 + $0x40] sm:$0xff] }
0x124a   :  { %v1753_v29 = vsel %vm74_vm2, %v1745_v28, 0.0  ;;  %v59_v52 = vpack.c.bf16 %v56_v34, %v55_v12  ;;  %v58_v28 = vld [vmem:[#allocation5 + $0x58] sm:$0xff] }
0x124b   :  { %v1717_v4 = vrot.slane %v1716_v8, 2  ;;  %v1723_v39 = vadd.f32 %v1722_v17, %v1721_v61  ;;  %v1754_v33 = vrot.slane %v1753_v29, 4  ;;  %v1748_v3 = vadd.f32 %v1747_v38, %v1746_v37  ;;  %v57_v61 = vld [vmem:[#allocation5 + $0x50] sm:$0xff] }
0x124c   :  { %2205 = vmatpush3.bf16.msra.mxu0 %v59_v52  ;;  %v1830_v38 = vsel %vm74_vm2, %v2865_v60, 0.0 }
0x124d   :  { %v1718_v53 = vadd.f32 %v1717_v4, %v1716_v8  ;;  %v1724_v19 = vrot.slane %v1723_v39, 2  ;;  %v1755_v49 = vadd.f32 %v1754_v33, %v1753_v29  ;;  %v1749_v22 = vrot.slane %v1748_v3, 2  ;;  %2206 = vmatprep.subr.bf16.mxu0 %v2728_v30 }
0x124e   :  { %v60_v8 = vpack.c.bf16 %v58_v28, %v57_v61  ;;  %v1831_v29 = vrot.slane %v1830_v38, 4 }
0x124f   :  { %v1719_v26 = vrot.slane %v1718_v53, 1  ;;  %v1725_v31 = vadd.f32 %v1724_v19, %v1723_v39  ;;  %v1756_v11 = vrot.slane %v1755_v49, 2  ;;  %v1750_v7 = vadd.f32 %v1749_v22, %v1748_v3 }
0x1250   :  { %2207 = vmatpush3.bf16.msra.mxu0 %v60_v8  ;;  %v1832_v30 = vadd.f32 %v1831_v29, %v1830_v38 }
0x1251   :  { %v1726_v23 = vrot.slane %v1725_v31, 1  ;;  %v1757_v25 = vadd.f32 %v1756_v11, %v1755_v49  ;;  %v1751_v32 = vrot.slane %v1750_v7, 1  ;;  %v1720_v2 = vadd.f32 %v1719_v26, %v1718_v53 }
0x1252   :  { %v1833_v33 = vrot.slane %v1832_v30, 2 }
0x1253   :  { %v1727_v47 = vadd.f32 %v1726_v23, %v1725_v31  ;;  %v1758_v6 = vrot.slane %v1757_v25, 1  ;;  %v1752_v40 = vadd.f32 %v1751_v32, %v1750_v7 }
0x1255   :  { %v1730_v10 = vsel %vm609_vm3, %v1727_v47, %v1720_v2  ;;  %v1759_v41 = vadd.f32 %v1758_v6, %v1757_v25 }
0x1256   :  { %v1732_v21 = vadd.f32 %v2299_v35, %v1730_v10  ;;  %v1967_v10 = vld [vmem:[#allocation5 + $0xa8] ss:$0 sm:$0xff] }
0x1257   :  { %v1762_v43 = vsel %vm609_vm3, %v1759_v41, %v1752_v40 }
0x1258   :  { %2300 = vrcp.f32 %v1732_v21  ;;  %v1764_v44 = vadd.f32 %v1762_v43, %v1737_v42 }
0x1262   :  { %v2301_v58 = vpop.eup %2300 }
0x1263   :  { %v1765_v55 = vmul.f32 %v2301_v58, %v1764_v44 }
0x1265   :  { %v1766_v24 = vpack.c.bf16 %v1765_v55, %v1765_v55 }
0x1267   :  { %2201 = vmatmul.mubr.msk.bf16.vlgmr.msra.gmra.mrb[56].mxu1 %vm74_vm2, %v1766_v24 }
0x133a   :  { %v1804_v59 = vpop.f32.mrb[56].mxu1 }
0x133b   :  { %v1805_v62 = vadd.f32 %v1804_v59, %v2757_v9  ;;  %v2202_v48 = vpop.f32.mrb[57].mxu1 }
0x133c   :  { %v1807_v50 = vpop.f32.mrb[58].mxu1 }
0x133d   :  { %v1810_v1 = vmax.f32 %v1805_v62, 0.0  ;;  %v2203_v5 = vpop.f32.mrb[59].mxu1 }
0x133f   :  { %v1811_v46 = vsel %vm948_vm4, %v1810_v1, 0.0 }
0x1340   :  { %1812 = vadd.xlane.f32.xlu0 %v1811_v46 }
0x13cd   :  { %v1813_v63 = vpop.xlane.xlu0 %1812 }
0x13ce   :  { %v1814_v15 = vmul.f32 0.03125, %v1813_v63 }
0x13d0   :  { %v1815_v45 = vsub.f32 %v1810_v1, %v1814_v15 }
0x13d2   :  { %v1816_v18 = vmul.f32 %v1815_v45, %v1815_v45 }
0x13d4   :  { %v1817_v54 = vsel %vm948_vm4, %v1816_v18, 0.0 }
0x13d5   :  { %1818 = vadd.xlane.f32.xlu1 %v1817_v54 }
0x1462   :  { %v1819_v14 = vpop.xlane.xlu1 %1818 }
0x1463   :  { %v1820_v36 = vmul.f32 0.03125, %v1819_v14 }
0x1465   :  { %v1821_v56 = vadd.f32 1e-12, %v1820_v36 }
0x1467   :  { %2302 = vrsqrt.f32 %v1821_v56 }
0x1471   :  { %v2303_v57 = vpop.eup %2302 }
0x1472   :  { %v1823_v9 = vmul.f32 %v2303_v57, %v1815_v45 }
0x1474   :  { %1825 = vrot.lane.b32.xlu0 %v1823_v9, %s2387_s7 }
0x14e6   :  { %v1826_v27 = vpop.permute.xlu0 %1825 }
0x14e7   :  { %v1828_v20 = vmul.f32 %v2860_v16, %v1826_v27  ;;  %v1837_v16 = vsel %vm74_vm2, %v2868_v13, 0.0 }
0x14e8   :  { %v1838_v4 = vrot.slane %v1837_v16, 4 }
0x14e9   :  { %v1829_v37 = vadd.f32 %v1828_v20, %v2638_v51  ;;  %v1834_v51 = vadd.f32 %v1833_v33, %v1832_v30 }
0x14ea   :  { %v1839_v39 = vadd.f32 %v1838_v4, %v1837_v16 }
0x14eb   :  { %1848 = vrot.lane.b32.xlu0 %v1829_v37, %s2387_s7  ;;  %v1847_v17 = vrot.slane %v1829_v37, 1  ;;  %v1835_v19 = vrot.slane %v1834_v51, 1 }
0x14ec   :  { %v1840_v3 = vrot.slane %v1839_v39, 2 }
0x14ed   :  { %1850 = vrot.lane.b32.xlu1 %v1847_v17, %s2387_s7  ;;  %v1836_v22 = vadd.f32 %v1835_v19, %v1834_v51 }
0x14ee   :  { %v1841_v53 = vadd.f32 %v1840_v3, %v1839_v39 }
0x14ef   :  { %v1844_v31 = vmul.f32 0.125, %v1836_v22 }
0x14f0   :  { %v1842_v49 = vrot.slane %v1841_v53, 1 }
0x14f2   :  { %v1843_v26 = vadd.f32 %v1842_v49, %v1841_v53 }
0x14f4   :  { %v1845_v23 = vmul.f32 0.125, %v1843_v26 }
0x155d   :  { %v1849_v11 = vpop.permute.xlu0 %1848 }
0x155e   :  { %v1854_v7 = vadd.f32 %v1849_v11, %v1844_v31 }
0x155f   :  { %v1851_v60 = vpop.permute.xlu1 %1850 }
0x1560   :  { %v1855_v25 = vadd.f32 %v1851_v60, %v1845_v23  ;;  %v1856_v32 = vpack.c.bf16 %v1854_v7, %v1854_v7 }
0x1562   :  { %v1857_v13 = vpack.c.bf16 %v1855_v25, %v1855_v25  ;;  %v1864_v2 = vunpack.c.l.b16 %v1856_v32 }
0x1564   :  { %v1865_v35 = vunpack.c.l.b16 %v1857_v13 }
0x1566   :  { %v1866_v47 = vrot.slane %v1865_v35, 7 }
0x1568   :  { %v1867_v6 = vsel %vm609_vm3, %v1866_v47, %v1864_v2 }
0x1569   :  { %v1868_v0 = vpack.c.b16 %v1867_v6, %v1867_v6 }
0x156b   :  { %2209 = vmatmul.mubr.msk.bf16.vlgmr.msra.gmra.mrb[60].mxu0 %vm74_vm2, %v1868_v0 }
0x163e   :  { %v1906_v40 = vpop.f32.mrb[60].mxu0 }
0x163f   :  { %v1907_v41 = vadd.f32 %v1967_v10, %v1906_v40  ;;  %v2210_v21 = vpop.f32.mrb[61].mxu0 }
0x1640   :  { %v1909_v42 = vpop.f32.mrb[62].mxu0 }
0x1641   :  { %1913 = vst [vmem:[#allocation7] sm:$0x3] %v1907_v41  ;;  %v2211_v43 = vpop.f32.mrb[63].mxu0 }
0x1642   :  { %2362 = shalt.err (!%p2359_p6)
}
0x1643   :  { %s2363_s13 = scalar_lea.hbm %s2941_s2, 128 }
0x1644   :  { %p2364_p7 = scmp.ne.s32.totalorder %s2941_s2, %s2363_s13  ;;  %p2367_p8 = scmp.lt.u32.totalorder %s2363_s13, %s2941_s2 }
0x1646   :  { %p2369_p9 = pnand %p2367_p8, %p2364_p7 }
0x1648   :  { %2372 = shalt.err (!%p2369_p9)
}
0x1649   :  { %1923 = dma.vmem_to_hbm [thread:$0]  %s1921_s9, 128, %s2941_s2, [#allocation4]  }
0x164a   :  { %2377 = dma.done.wait [#allocation4], 128  }
0x164b   :  { %2378 = vsyncadd [#allocation4], 4294967168 }
0x164c   :  { %1927 = vsyncpa [#allocation3], 1 }
0x164d   :  { %1928 = vsyncpa [#allocation6], 1 }
0x164e   :  { %1929 = vsyncpa [#allocation4], 1 }

</bundles_post_ra>
